<compile_context>
chip_gen: v7x
topology: tpu7x:2x2x1
jax: 0.10.0
libtpu: 0.0.40
codegen_flags: <defaults>
</compile_context>

<pallas_src>
import functools

import numpy as np
import jax
import jax.numpy as jnp
from jax import lax
from jax.experimental import pallas as pl
from jax.experimental.pallas import tpu as pltpu


# ---------------------------------------------------------------------------
# One-time probe: does pltpu.roll follow jnp.roll semantics
# (result[i] = x[(i - shift) % n])?  True / False / None (unknown -> fallback).
# ---------------------------------------------------------------------------
@functools.lru_cache(maxsize=1)
def _pltpu_roll_like_jnp():
    try:
        x = np.arange(8 * 128, dtype=np.float32).reshape(8, 128)

        def _k(x_ref, o_ref):
            o_ref[...] = pltpu.roll(x_ref[...], 1, 1)

        y = pl.pallas_call(
            _k, out_shape=jax.ShapeDtypeStruct((8, 128), jnp.float32)
        )(jnp.asarray(x))
        y = np.asarray(jax.block_until_ready(y))
        if np.array_equal(y, np.roll(x, 1, axis=1)):
            return True
        if np.array_equal(y, np.roll(x, -1, axis=1)):
            return False
    except Exception:
        pass
    return None


def _tpu_generation():
    try:
        kind = jax.devices()[0].device_kind.lower()
    except Exception:
        return "unknown"
    if "v7" in kind or "7x" in kind:
        return "v7x"
    if "v6" in kind:
        return "v6e"
    if "v5 lite" in kind or "v5e" in kind or "v5lite" in kind:
        return "v5e"
    return "unknown"


def _spatial_premask(w_sp, H, W, K=7):
    """(K*K, 2, H*W) float32: per-tap conv weight (row0=max map, row1=mean map)
    multiplied by the zero-padding validity mask for that tap."""
    HW = H * W
    PAD = (K - 1) // 2
    KK = K * K
    p = np.arange(HW)
    x_idx, y_idx = p % W, p // W
    masks = np.zeros((KK, HW), np.float32)
    for dy in range(K):
        for dx in range(K):
            ox, oy = dx - PAD, dy - PAD
            masks[dy * K + dx] = (
                (x_idx + ox >= 0) & (x_idx + ox < W)
                & (y_idx + oy >= 0) & (y_idx + oy < H)).astype(np.float32)
    taps = w_sp.reshape(2, KK).T                      # (KK, 2): col0=max, col1=mean
    return taps[:, :, None] * jnp.asarray(masks)[:, None, :]   # (KK, 2, HW)


def make_cbam_kernel(Nb, C, H, W, K=7, roll_like_jnp=None):
    HW = H * W
    PAD = (K - 1) // 2
    use_roll = (roll_like_jnp is not None) and (HW % 128 == 0)

    def lane_shift(v, s):
        """Return r with r[:, p] = v[:, (p + s) % HW] (s is a static int)."""
        s = s % HW
        if s == 0:
            return v
        if use_roll:
            amt = (HW - s) % HW if roll_like_jnp else s
            return pltpu.roll(v, amt, 1)
        # Guaranteed-correct fallback: 2 lane slices + concat (== jnp.roll).
        return jnp.concatenate([v[:, s:], v[:, :s]], axis=1)

    def kernel(x_ref, w1t_ref, b1_ref, w2_ref, b2_ref, premask_ref, bsp_ref,
               o_ref):
        # Small weights / conv bias: read once per grid step, reused for every
        # image in the block (hoisted out of the image loop).
        w1t = w1t_ref[...]          # (C, hidden)  == W1.T
        b1 = b1_ref[...]            # (1, hidden)
        w2 = w2_ref[...]            # (C, hidden)  == W2 (PyTorch layout)
        b2 = b2_ref[...]            # (C, 1)
        bias_sp = bsp_ref[0]        # scalar conv bias (SMEM), hoisted

        def mlp(v):                 # v: (C, 1) pooled vector
            h = jnp.maximum(jnp.sum(w1t * v, axis=0, keepdims=True) + b1, 0.0)
            return jnp.sum(w2 * h, axis=1, keepdims=True) + b2

        def sigmoid(z):
            # Exact 1/(1+e): kept for numerical margin (approx reciprocal is a
            # free EUP win but adds ~2^-12 relative error on the output).
            return 1.0 / (1.0 + jnp.exp(-z))

        def body(b, carry):
            xf = x_ref[b]                                   # (C, HW) lane dense

            # ------------------------- ChannelGate -------------------------
            avg = jnp.mean(xf, axis=1, keepdims=True)       # (C, 1)  avg_pool2d
            mx = jnp.max(xf, axis=1, keepdims=True)         # (C, 1)  max_pool2d
            cscale = sigmoid(mlp(avg) + mlp(mx))            # (C, 1)
            # TODO(synk): for C >= 256 the two MLPs are cheaper as MXU matmuls
            # on a stacked (2, C) pooled matrix; kept on VPU/XLU here.
            xc = xf * cscale                                # (C, HW)

            # ------------------------- SpatialGate -------------------------
            # Channel max / mean maps stacked on 2 sublanes of the same vregs
            # so each lane roll below serves both maps at once.
            comp = jnp.concatenate(
                [jnp.max(xc, axis=0, keepdims=True),
                 jnp.mean(xc, axis=0, keepdims=True)], axis=0)      # (2, HW)

            acc = jnp.zeros((2, HW), jnp.float32)
            for dy in range(K):
                for dx in range(K):
                    t = dy * K + dx
                    s = (dy - PAD) * W + (dx - PAD)   # flat source offset
                    acc = acc + premask_ref[t] * lane_shift(comp, s)
            conv = jnp.sum(acc, axis=0, keepdims=True) + bias_sp    # (1, HW)

            o_ref[b] = xc * sigmoid(conv)                   # (C, HW)
            return carry

        if Nb == 1:
            body(0, 0)
        else:
            lax.fori_loop(0, Nb, body, 0, unroll=2)

    return kernel


def cbam_pallas(x, params, *, block_bytes_target=None, max_images_per_block=64):
    N, C, H, W = x.shape
    HW = H * W
    K = 7
    KK = K * K
    hidden = params["w1"].shape[0]

    gen = _tpu_generation()
    if block_bytes_target is None:
        # ~4 MiB blocks on v7x (64 MiB VMEM, fast HBM), ~6 MiB on v5e/v6e.
        block_bytes_target = (4 << 20) if gen == "v7x" else (6 << 20)
    vmem_cap = (48 << 20) if gen == "v7x" else (100 << 20)

    # Flat lane-dense (N, C, HW) layout end-to-end (HW on the lane axis).
    x_flat = x.reshape(N, C, HW)
    w1t = params["w1"].T                                  # (C, hidden)
    b1r = params["b1"].reshape(1, hidden)
    w2 = params["w2"]                                     # (C, hidden)
    b2c = params["b2"].reshape(C, 1)
    premask = _spatial_premask(params["w_sp"], H, W, K)   # (KK, 2, HW)
    bsp = params["b_sp"].reshape(1)

    per_image = C * HW * 4
    lane_pad = -(-HW // 128) * 128
    premask_vmem = KK * 8 * lane_pad * 4                  # padded VMEM footprint

    def est(nb_):
        # double-buffered in + out blocks, resident premask (x2 buffers),
        # per-image temporaries and slack.
        return 4 * nb_ * per_image + 2 * premask_vmem + 2 * per_image + (2 << 20)

    nb = max(1, min(max_images_per_block, block_bytes_target // per_image, N))
    if N >= 2:
        nb = min(nb, N // 2)        # keep >= 2 grid steps (v7x megacore sharding)
    while nb > 1 and est(nb) > vmem_cap:
        nb -= 1
    while N % nb != 0:
        nb -= 1
    grid = (N // nb,)

    cp_kwargs = dict(dimension_semantics=("parallel",))
    vmem_est = est(nb)
    if vmem_est > (14 << 20):       # v5e default scoped budget is only ~16 MiB
        cp_kwargs["vmem_limit_bytes"] = int(min(vmem_est, vmem_cap))

    kern = make_cbam_kernel(nb, C, H, W, K,
                            roll_like_jnp=_pltpu_roll_like_jnp())

    out_flat = pl.pallas_call(
        kern,
        out_shape=jax.ShapeDtypeStruct((N, C, HW), jnp.float32),
        grid=grid,
        in_specs=[
            pl.BlockSpec((nb, C, HW), lambda i: (i, 0, 0)),
            pl.BlockSpec((C, hidden), lambda i: (0, 0)),
            pl.BlockSpec((1, hidden), lambda i: (0, 0)),
            pl.BlockSpec((C, hidden), lambda i: (0, 0)),
            pl.BlockSpec((C, 1), lambda i: (0, 0)),
            pl.BlockSpec((KK, 2, HW), lambda i: (0, 0, 0)),
            pl.BlockSpec(memory_space=pltpu.MemorySpace.SMEM),   # conv bias (1,)
        ],
        out_specs=pl.BlockSpec((nb, C, HW), lambda i: (i, 0, 0)),
        compiler_params=pltpu.CompilerParams(**cp_kwargs),
    )(x_flat, w1t, b1r, w2, b2c, premask, bsp)

    return out_flat.reshape(N, C, H, W)


# ----------------------------------------------------------------------------
# Pure-JAX reference (mirrors the PyTorch forward) for the correctness check.
# ----------------------------------------------------------------------------
def cbam_ref(x, params):
    avg = x.mean(axis=(2, 3))                          # (N, C)
    mx = x.max(axis=(2, 3))                            # (N, C)

    def mlp(v):
        h = jnp.maximum(v @ params["w1"].T + params["b1"], 0.0)
        return h @ params["w2"].T + params["b2"]

    att = mlp(avg) + mlp(mx)
    sc = jax.nn.sigmoid(att)[:, :, None, None]
    xc = x * sc

    cmax = xc.max(axis=1, keepdims=True)
    cmean = xc.mean(axis=1, keepdims=True)
    comp = jnp.concatenate([cmax, cmean], axis=1)
    conv = lax.conv_general_dilated(
        comp, params["w_sp"], window_strides=(1, 1),
        padding=((3, 3), (3, 3)),
        dimension_numbers=("NCHW", "OIHW", "NCHW"),
    ) + params["b_sp"].reshape(1, 1, 1, 1)
    return xc * jax.nn.sigmoid(conv)


if __name__ == "__main__":
    # Small shapes consistent with CBAM(gate_channels=32, reduction_ratio=16).
    N, C, H, W = 2, 32, 16, 16
    reduction_ratio = 16
    hidden = C // reduction_ratio

    key = jax.random.PRNGKey(0)
    k = jax.random.split(key, 7)
    x = jax.random.normal(k[0], (N, C, H, W), dtype=jnp.float32)

    params = {
        "w1": 0.1 * jax.random.normal(k[1], (hidden, C), dtype=jnp.float32),
        "b1": 0.1 * jax.random.normal(k[2], (hidden,), dtype=jnp.float32),
        "w2": 0.1 * jax.random.normal(k[3], (C, hidden), dtype=jnp.float32),
        "b2": 0.1 * jax.random.normal(k[4], (C,), dtype=jnp.float32),
        "w_sp": 0.1 * jax.random.normal(k[5], (1, 2, 7, 7), dtype=jnp.float32),
        "b_sp": 0.1 * jax.random.normal(k[6], (1,), dtype=jnp.float32),
    }

    out = jax.block_until_ready(cbam_pallas(x, params))
    ref = jax.block_until_ready(cbam_ref(x, params))

    err = float(jnp.max(jnp.abs(out - ref)))
    assert out.shape == (N, C, H, W)
    assert err < 1e-3, f"max abs error too large: {err}"
    print("KERNEL_OK")
</pallas_src>

<mosaic_0001>
module attributes {stable_mosaic.version = 11 : i64} {
  func.func @_k(%arg0: memref<8x128xf32, #tpu.memory_space<vmem>>, %arg1: memref<8x128xf32, #tpu.memory_space<vmem>>) attributes {dimension_semantics = [], scalar_prefetch = 0 : i64, scratch_operands = 0 : i64, tpu.core_type = #tpu.core_type<tc>} {
    %c0 = arith.constant 0 : index
    %c0_0 = arith.constant 0 : index
    %0 = vector.load %arg0[%c0, %c0_0] : memref<8x128xf32, #tpu.memory_space<vmem>>, vector<8x128xf32>
    %c1_i32 = arith.constant 1 : i32
    %1 = tpu.dynamic_rotate %0 by %c1_i32 dim 1 : vector<8x128xf32>, i32 -> vector<8x128xf32>
    %c0_1 = arith.constant 0 : index
    %c0_2 = arith.constant 0 : index
    %2 = vector.load %arg1[%c0_1, %c0_2] : memref<8x128xf32, #tpu.memory_space<vmem>>, vector<8x128xf32>
    tpu.vector_store %arg1[%c0_1, %c0_2], %1 {strides = array<i32>} : memref<8x128xf32, #tpu.memory_space<vmem>>, vector<8x128xf32>,
    return
  }
}

module attributes {stable_mosaic.version = 11 : i64} {
  func.func @kernel(%arg0: i32, %arg1: memref<1x32x256xf32, #tpu.memory_space<vmem>>, %arg2: memref<32x2xf32, #tpu.memory_space<vmem>>, %arg3: memref<1x2xf32, #tpu.memory_space<vmem>>, %arg4: memref<32x2xf32, #tpu.memory_space<vmem>>, %arg5: memref<32x1xf32, #tpu.memory_space<vmem>>, %arg6: memref<49x2x256xf32, #tpu.memory_space<vmem>>, %arg7: memref<1xf32, #tpu.memory_space<smem>>, %arg8: memref<1x32x256xf32, #tpu.memory_space<vmem>>) attributes {dimension_semantics = [#tpu.dimension_semantics<parallel>], iteration_bounds = array<i64: 2>, scalar_prefetch = 0 : i64, scratch_operands = 0 : i64, tpu.core_type = #tpu.core_type<tc>, window_params = [{transform_indices = @transform_0, window_bounds = array<i64: 1, 32, 256>}, {pipeline_mode = #tpu.pipeline_mode<synchronous>, transform_indices = @transform_1, window_bounds = array<i64: 32, 2>}, {pipeline_mode = #tpu.pipeline_mode<synchronous>, transform_indices = @transform_2, window_bounds = array<i64: 1, 2>}, {pipeline_mode = #tpu.pipeline_mode<synchronous>, transform_indices = @transform_3, window_bounds = array<i64: 32, 2>}, {pipeline_mode = #tpu.pipeline_mode<synchronous>, transform_indices = @transform_4, window_bounds = array<i64: 32, 1>}, {pipeline_mode = #tpu.pipeline_mode<synchronous>, transform_indices = @transform_5, window_bounds = array<i64: 49, 2, 256>}, {transform_indices = @transform_6, window_bounds = array<i64: 1>}, {transform_indices = @transform_7, window_bounds = array<i64: 1, 32, 256>}]} {
    %c0 = arith.constant 0 : index
    %c0_0 = arith.constant 0 : index
    %0 = vector.load %arg2[%c0, %c0_0] : memref<32x2xf32, #tpu.memory_space<vmem>>, vector<32x2xf32>
    %c0_1 = arith.constant 0 : index
    %c0_2 = arith.constant 0 : index
    %1 = vector.load %arg3[%c0_1, %c0_2] : memref<1x2xf32, #tpu.memory_space<vmem>>, vector<1x2xf32>
    %c0_3 = arith.constant 0 : index
    %c0_4 = arith.constant 0 : index
    %2 = vector.load %arg4[%c0_3, %c0_4] : memref<32x2xf32, #tpu.memory_space<vmem>>, vector<32x2xf32>
    %c0_5 = arith.constant 0 : index
    %c0_6 = arith.constant 0 : index
    %3 = vector.load %arg5[%c0_5, %c0_6] : memref<32x1xf32, #tpu.memory_space<vmem>>, vector<32x1xf32>
    %c0_7 = arith.constant 0 : index
    %4 = memref.load %arg7[%c0_7] : memref<1xf32, #tpu.memory_space<smem>>
    %c0_8 = arith.constant 0 : index
    %c0_9 = arith.constant 0 : index
    %c0_10 = arith.constant 0 : index
    %5 = vector.load %arg1[%c0_8, %c0_9, %c0_10] : memref<1x32x256xf32, #tpu.memory_space<vmem>>, vector<1x32x256xf32>
    %6 = vector.shape_cast %5 : vector<1x32x256xf32> to vector<32x256xf32>
    %cst = arith.constant dense<0.000000e+00> : vector<32xf32>
    %7 = vector.multi_reduction <add>, %6, %cst [1] : vector<32x256xf32> to vector<32xf32>
    %8 = vector.shape_cast %7 : vector<32xf32> to vector<32x1xf32>
    %cst_11 = arith.constant 2.560000e+02 : f32
    %9 = vector.broadcast %cst_11 : f32 to vector<32x1xf32>
    %10 = arith.divf %8, %9 : vector<32x1xf32>
    %cst_12 = arith.constant dense<0xFF800000> : vector<32xf32>
    %11 = vector.multi_reduction <maximumf>, %6, %cst_12 [1] : vector<32x256xf32> to vector<32xf32>
    %12 = vector.shape_cast %11 : vector<32xf32> to vector<32x1xf32>
    %13 = vector.broadcast %10 : vector<32x1xf32> to vector<32x2xf32>
    %14 = arith.mulf %0, %13 : vector<32x2xf32>
    %cst_13 = arith.constant dense<0.000000e+00> : vector<2xf32>
    %15 = vector.multi_reduction <add>, %14, %cst_13 [0] : vector<32x2xf32> to vector<2xf32>
    %16 = vector.shape_cast %15 : vector<2xf32> to vector<1x2xf32>
    %17 = arith.addf %16, %1 : vector<1x2xf32>
    %cst_14 = arith.constant 0.000000e+00 : f32
    %18 = vector.broadcast %cst_14 : f32 to vector<1x2xf32>
    %19 = arith.maximumf %17, %18 : vector<1x2xf32>
    %20 = vector.broadcast %19 : vector<1x2xf32> to vector<32x2xf32>
    %21 = arith.mulf %2, %20 : vector<32x2xf32>
    %cst_15 = arith.constant dense<0.000000e+00> : vector<32xf32>
    %22 = vector.multi_reduction <add>, %21, %cst_15 [1] : vector<32x2xf32> to vector<32xf32>
    %23 = vector.shape_cast %22 : vector<32xf32> to vector<32x1xf32>
    %24 = arith.addf %23, %3 : vector<32x1xf32>
    %25 = vector.broadcast %12 : vector<32x1xf32> to vector<32x2xf32>
    %26 = arith.mulf %0, %25 : vector<32x2xf32>
    %cst_16 = arith.constant dense<0.000000e+00> : vector<2xf32>
    %27 = vector.multi_reduction <add>, %26, %cst_16 [0] : vector<32x2xf32> to vector<2xf32>
    %28 = vector.shape_cast %27 : vector<2xf32> to vector<1x2xf32>
    %29 = arith.addf %28, %1 : vector<1x2xf32>
    %cst_17 = arith.constant 0.000000e+00 : f32
    %30 = vector.broadcast %cst_17 : f32 to vector<1x2xf32>
    %31 = arith.maximumf %29, %30 : vector<1x2xf32>
    %32 = vector.broadcast %31 : vector<1x2xf32> to vector<32x2xf32>
    %33 = arith.mulf %2, %32 : vector<32x2xf32>
    %cst_18 = arith.constant dense<0.000000e+00> : vector<32xf32>
    %34 = vector.multi_reduction <add>, %33, %cst_18 [1] : vector<32x2xf32> to vector<32xf32>
    %35 = vector.shape_cast %34 : vector<32xf32> to vector<32x1xf32>
    %36 = arith.addf %35, %3 : vector<32x1xf32>
    %37 = arith.addf %24, %36 : vector<32x1xf32>
    %cst_19 = arith.constant 0.000000e+00 : f32
    %38 = vector.broadcast %cst_19 : f32 to vector<32x1xf32>
    %39 = arith.subf %38, %37 : vector<32x1xf32>
    %40 = math.exp %39 : vector<32x1xf32>
    %cst_20 = arith.constant 1.000000e+00 : f32
    %41 = vector.broadcast %cst_20 : f32 to vector<32x1xf32>
    %42 = arith.addf %41, %40 : vector<32x1xf32>
    %cst_21 = arith.constant 1.000000e+00 : f32
    %43 = vector.broadcast %cst_21 : f32 to vector<32x1xf32>
    %44 = arith.divf %43, %42 : vector<32x1xf32>
    %45 = vector.broadcast %44 : vector<32x1xf32> to vector<32x256xf32>
    %46 = arith.mulf %6, %45 : vector<32x256xf32>
    %cst_22 = arith.constant dense<0xFF800000> : vector<256xf32>
    %47 = vector.multi_reduction <maximumf>, %46, %cst_22 [0] : vector<32x256xf32> to vector<256xf32>
    %48 = vector.shape_cast %47 : vector<256xf32> to vector<1x256xf32>
    %cst_23 = arith.constant dense<0.000000e+00> : vector<256xf32>
    %49 = vector.multi_reduction <add>, %46, %cst_23 [0] : vector<32x256xf32> to vector<256xf32>
    %50 = vector.shape_cast %49 : vector<256xf32> to vector<1x256xf32>
    %cst_24 = arith.constant 3.200000e+01 : f32
    %51 = vector.broadcast %cst_24 : f32 to vector<1x256xf32>
    %52 = arith.divf %50, %51 : vector<1x256xf32>
    %53 = tpu.concatenate %48, %52 in 0 : vector<1x256xf32>, vector<1x256xf32> -> vector<2x256xf32>
    %cst_25 = arith.constant 0.000000e+00 : f32
    %54 = vector.broadcast %cst_25 : f32 to vector<2x256xf32>
    %c0_26 = arith.constant 0 : index
    %c0_27 = arith.constant 0 : index
    %c0_28 = arith.constant 0 : index
    %55 = vector.load %arg6[%c0_26, %c0_27, %c0_28] : memref<49x2x256xf32, #tpu.memory_space<vmem>>, vector<1x2x256xf32>
    %56 = vector.shape_cast %55 : vector<1x2x256xf32> to vector<2x256xf32>
    %57 = vector.extract_strided_slice %53 {offsets = [0, 205], sizes = [2, 51], strides = [1, 1]} : vector<2x256xf32> to vector<2x51xf32>
    %58 = vector.extract_strided_slice %53 {offsets = [0, 0], sizes = [2, 205], strides = [1, 1]} : vector<2x256xf32> to vector<2x205xf32>
    %59 = tpu.concatenate %57, %58 in 1 : vector<2x51xf32>, vector<2x205xf32> -> vector<2x256xf32>
    %60 = arith.mulf %56, %59 : vector<2x256xf32>
    %61 = arith.addf %54, %60 : vector<2x256xf32>
    %c1 = arith.constant 1 : index
    %c0_29 = arith.constant 0 : index
    %c0_30 = arith.constant 0 : index
    %62 = vector.load %arg6[%c1, %c0_29, %c0_30] : memref<49x2x256xf32, #tpu.memory_space<vmem>>, vector<1x2x256xf32>
    %63 = vector.shape_cast %62 : vector<1x2x256xf32> to vector<2x256xf32>
    %64 = vector.extract_strided_slice %53 {offsets = [0, 206], sizes = [2, 50], strides = [1, 1]} : vector<2x256xf32> to vector<2x50xf32>
    %65 = vector.extract_strided_slice %53 {offsets = [0, 0], sizes = [2, 206], strides = [1, 1]} : vector<2x256xf32> to vector<2x206xf32>
    %66 = tpu.concatenate %64, %65 in 1 : vector<2x50xf32>, vector<2x206xf32> -> vector<2x256xf32>
    %67 = arith.mulf %63, %66 : vector<2x256xf32>
    %68 = arith.addf %61, %67 : vector<2x256xf32>
    %c2 = arith.constant 2 : index
    %c0_31 = arith.constant 0 : index
    %c0_32 = arith.constant 0 : index
    %69 = vector.load %arg6[%c2, %c0_31, %c0_32] : memref<49x2x256xf32, #tpu.memory_space<vmem>>, vector<1x2x256xf32>
    %70 = vector.shape_cast %69 : vector<1x2x256xf32> to vector<2x256xf32>
    %71 = vector.extract_strided_slice %53 {offsets = [0, 207], sizes = [2, 49], strides = [1, 1]} : vector<2x256xf32> to vector<2x49xf32>
    %72 = vector.extract_strided_slice %53 {offsets = [0, 0], sizes = [2, 207], strides = [1, 1]} : vector<2x256xf32> to vector<2x207xf32>
    %73 = tpu.concatenate %71, %72 in 1 : vector<2x49xf32>, vector<2x207xf32> -> vector<2x256xf32>
    %74 = arith.mulf %70, %73 : vector<2x256xf32>
    %75 = arith.addf %68, %74 : vector<2x256xf32>
    %c3 = arith.constant 3 : index
    %c0_33 = arith.constant 0 : index
    %c0_34 = arith.constant 0 : index
    %76 = vector.load %arg6[%c3, %c0_33, %c0_34] : memref<49x2x256xf32, #tpu.memory_space<vmem>>, vector<1x2x256xf32>
    %77 = vector.shape_cast %76 : vector<1x2x256xf32> to vector<2x256xf32>
    %78 = vector.extract_strided_slice %53 {offsets = [0, 208], sizes = [2, 48], strides = [1, 1]} : vector<2x256xf32> to vector<2x48xf32>
    %79 = vector.extract_strided_slice %53 {offsets = [0, 0], sizes = [2, 208], strides = [1, 1]} : vector<2x256xf32> to vector<2x208xf32>
    %80 = tpu.concatenate %78, %79 in 1 : vector<2x48xf32>, vector<2x208xf32> -> vector<2x256xf32>
    %81 = arith.mulf %77, %80 : vector<2x256xf32>
    %82 = arith.addf %75, %81 : vector<2x256xf32>
    %c4 = arith.constant 4 : index
    %c0_35 = arith.constant 0 : index
    %c0_36 = arith.constant 0 : index
    %83 = vector.load %arg6[%c4, %c0_35, %c0_36] : memref<49x2x256xf32, #tpu.memory_space<vmem>>, vector<1x2x256xf32>
    %84 = vector.shape_cast %83 : vector<1x2x256xf32> to vector<2x256xf32>
    %85 = vector.extract_strided_slice %53 {offsets = [0, 209], sizes = [2, 47], strides = [1, 1]} : vector<2x256xf32> to vector<2x47xf32>
    %86 = vector.extract_strided_slice %53 {offsets = [0, 0], sizes = [2, 209], strides = [1, 1]} : vector<2x256xf32> to vector<2x209xf32>
    %87 = tpu.concatenate %85, %86 in 1 : vector<2x47xf32>, vector<2x209xf32> -> vector<2x256xf32>
    %88 = arith.mulf %84, %87 : vector<2x256xf32>
    %89 = arith.addf %82, %88 : vector<2x256xf32>
    %c5 = arith.constant 5 : index
    %c0_37 = arith.constant 0 : index
    %c0_38 = arith.constant 0 : index
    %90 = vector.load %arg6[%c5, %c0_37, %c0_38] : memref<49x2x256xf32, #tpu.memory_space<vmem>>, vector<1x2x256xf32>
    %91 = vector.shape_cast %90 : vector<1x2x256xf32> to vector<2x256xf32>
    %92 = vector.extract_strided_slice %53 {offsets = [0, 210], sizes = [2, 46], strides = [1, 1]} : vector<2x256xf32> to vector<2x46xf32>
    %93 = vector.extract_strided_slice %53 {offsets = [0, 0], sizes = [2, 210], strides = [1, 1]} : vector<2x256xf32> to vector<2x210xf32>
    %94 = tpu.concatenate %92, %93 in 1 : vector<2x46xf32>, vector<2x210xf32> -> vector<2x256xf32>
    %95 = arith.mulf %91, %94 : vector<2x256xf32>
    %96 = arith.addf %89, %95 : vector<2x256xf32>
    %c6 = arith.constant 6 : index
    %c0_39 = arith.constant 0 : index
    %c0_40 = arith.constant 0 : index
    %97 = vector.load %arg6[%c6, %c0_39, %c0_40] : memref<49x2x256xf32, #tpu.memory_space<vmem>>, vector<1x2x256xf32>
    %98 = vector.shape_cast %97 : vector<1x2x256xf32> to vector<2x256xf32>
    %99 = vector.extract_strided_slice %53 {offsets = [0, 211], sizes = [2, 45], strides = [1, 1]} : vector<2x256xf32> to vector<2x45xf32>
    %100 = vector.extract_strided_slice %53 {offsets = [0, 0], sizes = [2, 211], strides = [1, 1]} : vector<2x256xf32> to vector<2x211xf32>
    %101 = tpu.concatenate %99, %100 in 1 : vector<2x45xf32>, vector<2x211xf32> -> vector<2x256xf32>
    %102 = arith.mulf %98, %101 : vector<2x256xf32>
    %103 = arith.addf %96, %102 : vector<2x256xf32>
    %c7 = arith.constant 7 : index
    %c0_41 = arith.constant 0 : index
    %c0_42 = arith.constant 0 : index
    %104 = vector.load %arg6[%c7, %c0_41, %c0_42] : memref<49x2x256xf32, #tpu.memory_space<vmem>>, vector<1x2x256xf32>
    %105 = vector.shape_cast %104 : vector<1x2x256xf32> to vector<2x256xf32>
    %106 = vector.extract_strided_slice %53 {offsets = [0, 221], sizes = [2, 35], strides = [1, 1]} : vector<2x256xf32> to vector<2x35xf32>
    %107 = vector.extract_strided_slice %53 {offsets = [0, 0], sizes = [2, 221], strides = [1, 1]} : vector<2x256xf32> to vector<2x221xf32>
    %108 = tpu.concatenate %106, %107 in 1 : vector<2x35xf32>, vector<2x221xf32> -> vector<2x256xf32>
    %109 = arith.mulf %105, %108 : vector<2x256xf32>
    %110 = arith.addf %103, %109 : vector<2x256xf32>
    %c8 = arith.constant 8 : index
    %c0_43 = arith.constant 0 : index
    %c0_44 = arith.constant 0 : index
    %111 = vector.load %arg6[%c8, %c0_43, %c0_44] : memref<49x2x256xf32, #tpu.memory_space<vmem>>, vector<1x2x256xf32>
    %112 = vector.shape_cast %111 : vector<1x2x256xf32> to vector<2x256xf32>
    %113 = vector.extract_strided_slice %53 {offsets = [0, 222], sizes = [2, 34], strides = [1, 1]} : vector<2x256xf32> to vector<2x34xf32>
    %114 = vector.extract_strided_slice %53 {offsets = [0, 0], sizes = [2, 222], strides = [1, 1]} : vector<2x256xf32> to vector<2x222xf32>
    %115 = tpu.concatenate %113, %114 in 1 : vector<2x34xf32>, vector<2x222xf32> -> vector<2x256xf32>
    %116 = arith.mulf %112, %115 : vector<2x256xf32>
    %117 = arith.addf %110, %116 : vector<2x256xf32>
    %c9 = arith.constant 9 : index
    %c0_45 = arith.constant 0 : index
    %c0_46 = arith.constant 0 : index
    %118 = vector.load %arg6[%c9, %c0_45, %c0_46] : memref<49x2x256xf32, #tpu.memory_space<vmem>>, vector<1x2x256xf32>
    %119 = vector.shape_cast %118 : vector<1x2x256xf32> to vector<2x256xf32>
    %120 = vector.extract_strided_slice %53 {offsets = [0, 223], sizes = [2, 33], strides = [1, 1]} : vector<2x256xf32> to vector<2x33xf32>
    %121 = vector.extract_strided_slice %53 {offsets = [0, 0], sizes = [2, 223], strides = [1, 1]} : vector<2x256xf32> to vector<2x223xf32>
    %122 = tpu.concatenate %120, %121 in 1 : vector<2x33xf32>, vector<2x223xf32> -> vector<2x256xf32>
    %123 = arith.mulf %119, %122 : vector<2x256xf32>
    %124 = arith.addf %117, %123 : vector<2x256xf32>
    %c10 = arith.constant 10 : index
    %c0_47 = arith.constant 0 : index
    %c0_48 = arith.constant 0 : index
    %125 = vector.load %arg6[%c10, %c0_47, %c0_48] : memref<49x2x256xf32, #tpu.memory_space<vmem>>, vector<1x2x256xf32>
    %126 = vector.shape_cast %125 : vector<1x2x256xf32> to vector<2x256xf32>
    %127 = vector.extract_strided_slice %53 {offsets = [0, 224], sizes = [2, 32], strides = [1, 1]} : vector<2x256xf32> to vector<2x32xf32>
    %128 = vector.extract_strided_slice %53 {offsets = [0, 0], sizes = [2, 224], strides = [1, 1]} : vector<2x256xf32> to vector<2x224xf32>
    %129 = tpu.concatenate %127, %128 in 1 : vector<2x32xf32>, vector<2x224xf32> -> vector<2x256xf32>
    %130 = arith.mulf %126, %129 : vector<2x256xf32>
    %131 = arith.addf %124, %130 : vector<2x256xf32>
    %c11 = arith.constant 11 : index
    %c0_49 = arith.constant 0 : index
    %c0_50 = arith.constant 0 : index
    %132 = vector.load %arg6[%c11, %c0_49, %c0_50] : memref<49x2x256xf32, #tpu.memory_space<vmem>>, vector<1x2x256xf32>
    %133 = vector.shape_cast %132 : vector<1x2x256xf32> to vector<2x256xf32>
    %134 = vector.extract_strided_slice %53 {offsets = [0, 225], sizes = [2, 31], strides = [1, 1]} : vector<2x256xf32> to vector<2x31xf32>
    %135 = vector.extract_strided_slice %53 {offsets = [0, 0], sizes = [2, 225], strides = [1, 1]} : vector<2x256xf32> to vector<2x225xf32>
    %136 = tpu.concatenate %134, %135 in 1 : vector<2x31xf32>, vector<2x225xf32> -> vector<2x256xf32>
    %137 = arith.mulf %133, %136 : vector<2x256xf32>
    %138 = arith.addf %131, %137 : vector<2x256xf32>
    %c12 = arith.constant 12 : index
    %c0_51 = arith.constant 0 : index
    %c0_52 = arith.constant 0 : index
    %139 = vector.load %arg6[%c12, %c0_51, %c0_52] : memref<49x2x256xf32, #tpu.memory_space<vmem>>, vector<1x2x256xf32>
    %140 = vector.shape_cast %139 : vector<1x2x256xf32> to vector<2x256xf32>
    %141 = vector.extract_strided_slice %53 {offsets = [0, 226], sizes = [2, 30], strides = [1, 1]} : vector<2x256xf32> to vector<2x30xf32>
    %142 = vector.extract_strided_slice %53 {offsets = [0, 0], sizes = [2, 226], strides = [1, 1]} : vector<2x256xf32> to vector<2x226xf32>
    %143 = tpu.concatenate %141, %142 in 1 : vector<2x30xf32>, vector<2x226xf32> -> vector<2x256xf32>
    %144 = arith.mulf %140, %143 : vector<2x256xf32>
    %145 = arith.addf %138, %144 : vector<2x256xf32>
    %c13 = arith.constant 13 : index
    %c0_53 = arith.constant 0 : index
    %c0_54 = arith.constant 0 : index
    %146 = vector.load %arg6[%c13, %c0_53, %c0_54] : memref<49x2x256xf32, #tpu.memory_space<vmem>>, vector<1x2x256xf32>
    %147 = vector.shape_cast %146 : vector<1x2x256xf32> to vector<2x256xf32>
    %148 = vector.extract_strided_slice %53 {offsets = [0, 227], sizes = [2, 29], strides = [1, 1]} : vector<2x256xf32> to vector<2x29xf32>
    %149 = vector.extract_strided_slice %53 {offsets = [0, 0], sizes = [2, 227], strides = [1, 1]} : vector<2x256xf32> to vector<2x227xf32>
    %150 = tpu.concatenate %148, %149 in 1 : vector<2x29xf32>, vector<2x227xf32> -> vector<2x256xf32>
    %151 = arith.mulf %147, %150 : vector<2x256xf32>
    %152 = arith.addf %145, %151 : vector<2x256xf32>
    %c14 = arith.constant 14 : index
    %c0_55 = arith.constant 0 : index
    %c0_56 = arith.constant 0 : index
    %153 = vector.load %arg6[%c14, %c0_55, %c0_56] : memref<49x2x256xf32, #tpu.memory_space<vmem>>, vector<1x2x256xf32>
    %154 = vector.shape_cast %153 : vector<1x2x256xf32> to vector<2x256xf32>
    %155 = vector.extract_strided_slice %53 {offsets = [0, 237], sizes = [2, 19], strides = [1, 1]} : vector<2x256xf32> to vector<2x19xf32>
    %156 = vector.extract_strided_slice %53 {offsets = [0, 0], sizes = [2, 237], strides = [1, 1]} : vector<2x256xf32> to vector<2x237xf32>
    %157 = tpu.concatenate %155, %156 in 1 : vector<2x19xf32>, vector<2x237xf32> -> vector<2x256xf32>
    %158 = arith.mulf %154, %157 : vector<2x256xf32>
    %159 = arith.addf %152, %158 : vector<2x256xf32>
    %c15 = arith.constant 15 : index
    %c0_57 = arith.constant 0 : index
    %c0_58 = arith.constant 0 : index
    %160 = vector.load %arg6[%c15, %c0_57, %c0_58] : memref<49x2x256xf32, #tpu.memory_space<vmem>>, vector<1x2x256xf32>
    %161 = vector.shape_cast %160 : vector<1x2x256xf32> to vector<2x256xf32>
    %162 = vector.extract_strided_slice %53 {offsets = [0, 238], sizes = [2, 18], strides = [1, 1]} : vector<2x256xf32> to vector<2x18xf32>
    %163 = vector.extract_strided_slice %53 {offsets = [0, 0], sizes = [2, 238], strides = [1, 1]} : vector<2x256xf32> to vector<2x238xf32>
    %164 = tpu.concatenate %162, %163 in 1 : vector<2x18xf32>, vector<2x238xf32> -> vector<2x256xf32>
    %165 = arith.mulf %161, %164 : vector<2x256xf32>
    %166 = arith.addf %159, %165 : vector<2x256xf32>
    %c16 = arith.constant 16 : index
    %c0_59 = arith.constant 0 : index
    %c0_60 = arith.constant 0 : index
    %167 = vector.load %arg6[%c16, %c0_59, %c0_60] : memref<49x2x256xf32, #tpu.memory_space<vmem>>, vector<1x2x256xf32>
    %168 = vector.shape_cast %167 : vector<1x2x256xf32> to vector<2x256xf32>
    %169 = vector.extract_strided_slice %53 {offsets = [0, 239], sizes = [2, 17], strides = [1, 1]} : vector<2x256xf32> to vector<2x17xf32>
    %170 = vector.extract_strided_slice %53 {offsets = [0, 0], sizes = [2, 239], strides = [1, 1]} : vector<2x256xf32> to vector<2x239xf32>
    %171 = tpu.concatenate %169, %170 in 1 : vector<2x17xf32>, vector<2x239xf32> -> vector<2x256xf32>
    %172 = arith.mulf %168, %171 : vector<2x256xf32>
    %173 = arith.addf %166, %172 : vector<2x256xf32>
    %c17 = arith.constant 17 : index
    %c0_61 = arith.constant 0 : index
    %c0_62 = arith.constant 0 : index
    %174 = vector.load %arg6[%c17, %c0_61, %c0_62] : memref<49x2x256xf32, #tpu.memory_space<vmem>>, vector<1x2x256xf32>
    %175 = vector.shape_cast %174 : vector<1x2x256xf32> to vector<2x256xf32>
    %176 = vector.extract_strided_slice %53 {offsets = [0, 240], sizes = [2, 16], strides = [1, 1]} : vector<2x256xf32> to vector<2x16xf32>
    %177 = vector.extract_strided_slice %53 {offsets = [0, 0], sizes = [2, 240], strides = [1, 1]} : vector<2x256xf32> to vector<2x240xf32>
    %178 = tpu.concatenate %176, %177 in 1 : vector<2x16xf32>, vector<2x240xf32> -> vector<2x256xf32>
    %179 = arith.mulf %175, %178 : vector<2x256xf32>
    %180 = arith.addf %173, %179 : vector<2x256xf32>
    %c18 = arith.constant 18 : index
    %c0_63 = arith.constant 0 : index
    %c0_64 = arith.constant 0 : index
    %181 = vector.load %arg6[%c18, %c0_63, %c0_64] : memref<49x2x256xf32, #tpu.memory_space<vmem>>, vector<1x2x256xf32>
    %182 = vector.shape_cast %181 : vector<1x2x256xf32> to vector<2x256xf32>
    %183 = vector.extract_strided_slice %53 {offsets = [0, 241], sizes = [2, 15], strides = [1, 1]} : vector<2x256xf32> to vector<2x15xf32>
    %184 = vector.extract_strided_slice %53 {offsets = [0, 0], sizes = [2, 241], strides = [1, 1]} : vector<2x256xf32> to vector<2x241xf32>
    %185 = tpu.concatenate %183, %184 in 1 : vector<2x15xf32>, vector<2x241xf32> -> vector<2x256xf32>
    %186 = arith.mulf %182, %185 : vector<2x256xf32>
    %187 = arith.addf %180, %186 : vector<2x256xf32>
    %c19 = arith.constant 19 : index
    %c0_65 = arith.constant 0 : index
    %c0_66 = arith.constant 0 : index
    %188 = vector.load %arg6[%c19, %c0_65, %c0_66] : memref<49x2x256xf32, #tpu.memory_space<vmem>>, vector<1x2x256xf32>
    %189 = vector.shape_cast %188 : vector<1x2x256xf32> to vector<2x256xf32>
    %190 = vector.extract_strided_slice %53 {offsets = [0, 242], sizes = [2, 14], strides = [1, 1]} : vector<2x256xf32> to vector<2x14xf32>
    %191 = vector.extract_strided_slice %53 {offsets = [0, 0], sizes = [2, 242], strides = [1, 1]} : vector<2x256xf32> to vector<2x242xf32>
    %192 = tpu.concatenate %190, %191 in 1 : vector<2x14xf32>, vector<2x242xf32> -> vector<2x256xf32>
    %193 = arith.mulf %189, %192 : vector<2x256xf32>
    %194 = arith.addf %187, %193 : vector<2x256xf32>
    %c20 = arith.constant 20 : index
    %c0_67 = arith.constant 0 : index
    %c0_68 = arith.constant 0 : index
    %195 = vector.load %arg6[%c20, %c0_67, %c0_68] : memref<49x2x256xf32, #tpu.memory_space<vmem>>, vector<1x2x256xf32>
    %196 = vector.shape_cast %195 : vector<1x2x256xf32> to vector<2x256xf32>
    %197 = vector.extract_strided_slice %53 {offsets = [0, 243], sizes = [2, 13], strides = [1, 1]} : vector<2x256xf32> to vector<2x13xf32>
    %198 = vector.extract_strided_slice %53 {offsets = [0, 0], sizes = [2, 243], strides = [1, 1]} : vector<2x256xf32> to vector<2x243xf32>
    %199 = tpu.concatenate %197, %198 in 1 : vector<2x13xf32>, vector<2x243xf32> -> vector<2x256xf32>
    %200 = arith.mulf %196, %199 : vector<2x256xf32>
    %201 = arith.addf %194, %200 : vector<2x256xf32>
    %c21 = arith.constant 21 : index
    %c0_69 = arith.constant 0 : index
    %c0_70 = arith.constant 0 : index
    %202 = vector.load %arg6[%c21, %c0_69, %c0_70] : memref<49x2x256xf32, #tpu.memory_space<vmem>>, vector<1x2x256xf32>
    %203 = vector.shape_cast %202 : vector<1x2x256xf32> to vector<2x256xf32>
    %204 = vector.extract_strided_slice %53 {offsets = [0, 253], sizes = [2, 3], strides = [1, 1]} : vector<2x256xf32> to vector<2x3xf32>
    %205 = vector.extract_strided_slice %53 {offsets = [0, 0], sizes = [2, 253], strides = [1, 1]} : vector<2x256xf32> to vector<2x253xf32>
    %206 = tpu.concatenate %204, %205 in 1 : vector<2x3xf32>, vector<2x253xf32> -> vector<2x256xf32>
    %207 = arith.mulf %203, %206 : vector<2x256xf32>
    %208 = arith.addf %201, %207 : vector<2x256xf32>
    %c22 = arith.constant 22 : index
    %c0_71 = arith.constant 0 : index
    %c0_72 = arith.constant 0 : index
    %209 = vector.load %arg6[%c22, %c0_71, %c0_72] : memref<49x2x256xf32, #tpu.memory_space<vmem>>, vector<1x2x256xf32>
    %210 = vector.shape_cast %209 : vector<1x2x256xf32> to vector<2x256xf32>
    %211 = vector.extract_strided_slice %53 {offsets = [0, 254], sizes = [2, 2], strides = [1, 1]} : vector<2x256xf32> to vector<2x2xf32>
    %212 = vector.extract_strided_slice %53 {offsets = [0, 0], sizes = [2, 254], strides = [1, 1]} : vector<2x256xf32> to vector<2x254xf32>
    %213 = tpu.concatenate %211, %212 in 1 : vector<2x2xf32>, vector<2x254xf32> -> vector<2x256xf32>
    %214 = arith.mulf %210, %213 : vector<2x256xf32>
    %215 = arith.addf %208, %214 : vector<2x256xf32>
    %c23 = arith.constant 23 : index
    %c0_73 = arith.constant 0 : index
    %c0_74 = arith.constant 0 : index
    %216 = vector.load %arg6[%c23, %c0_73, %c0_74] : memref<49x2x256xf32, #tpu.memory_space<vmem>>, vector<1x2x256xf32>
    %217 = vector.shape_cast %216 : vector<1x2x256xf32> to vector<2x256xf32>
    %218 = vector.extract_strided_slice %53 {offsets = [0, 255], sizes = [2, 1], strides = [1, 1]} : vector<2x256xf32> to vector<2x1xf32>
    %219 = vector.extract_strided_slice %53 {offsets = [0, 0], sizes = [2, 255], strides = [1, 1]} : vector<2x256xf32> to vector<2x255xf32>
    %220 = tpu.concatenate %218, %219 in 1 : vector<2x1xf32>, vector<2x255xf32> -> vector<2x256xf32>
    %221 = arith.mulf %217, %220 : vector<2x256xf32>
    %222 = arith.addf %215, %221 : vector<2x256xf32>
    %c24 = arith.constant 24 : index
    %c0_75 = arith.constant 0 : index
    %c0_76 = arith.constant 0 : index
    %223 = vector.load %arg6[%c24, %c0_75, %c0_76] : memref<49x2x256xf32, #tpu.memory_space<vmem>>, vector<1x2x256xf32>
    %224 = vector.shape_cast %223 : vector<1x2x256xf32> to vector<2x256xf32>
    %225 = arith.mulf %224, %53 : vector<2x256xf32>
    %226 = arith.addf %222, %225 : vector<2x256xf32>
    %c25 = arith.constant 25 : index
    %c0_77 = arith.constant 0 : index
    %c0_78 = arith.constant 0 : index
    %227 = vector.load %arg6[%c25, %c0_77, %c0_78] : memref<49x2x256xf32, #tpu.memory_space<vmem>>, vector<1x2x256xf32>
    %228 = vector.shape_cast %227 : vector<1x2x256xf32> to vector<2x256xf32>
    %229 = vector.extract_strided_slice %53 {offsets = [0, 1], sizes = [2, 255], strides = [1, 1]} : vector<2x256xf32> to vector<2x255xf32>
    %230 = vector.extract_strided_slice %53 {offsets = [0, 0], sizes = [2, 1], strides = [1, 1]} : vector<2x256xf32> to vector<2x1xf32>
    %231 = tpu.concatenate %229, %230 in 1 : vector<2x255xf32>, vector<2x1xf32> -> vector<2x256xf32>
    %232 = arith.mulf %228, %231 : vector<2x256xf32>
    %233 = arith.addf %226, %232 : vector<2x256xf32>
    %c26 = arith.constant 26 : index
    %c0_79 = arith.constant 0 : index
    %c0_80 = arith.constant 0 : index
    %234 = vector.load %arg6[%c26, %c0_79, %c0_80] : memref<49x2x256xf32, #tpu.memory_space<vmem>>, vector<1x2x256xf32>
    %235 = vector.shape_cast %234 : vector<1x2x256xf32> to vector<2x256xf32>
    %236 = vector.extract_strided_slice %53 {offsets = [0, 2], sizes = [2, 254], strides = [1, 1]} : vector<2x256xf32> to vector<2x254xf32>
    %237 = vector.extract_strided_slice %53 {offsets = [0, 0], sizes = [2, 2], strides = [1, 1]} : vector<2x256xf32> to vector<2x2xf32>
    %238 = tpu.concatenate %236, %237 in 1 : vector<2x254xf32>, vector<2x2xf32> -> vector<2x256xf32>
    %239 = arith.mulf %235, %238 : vector<2x256xf32>
    %240 = arith.addf %233, %239 : vector<2x256xf32>
    %c27 = arith.constant 27 : index
    %c0_81 = arith.constant 0 : index
    %c0_82 = arith.constant 0 : index
    %241 = vector.load %arg6[%c27, %c0_81, %c0_82] : memref<49x2x256xf32, #tpu.memory_space<vmem>>, vector<1x2x256xf32>
    %242 = vector.shape_cast %241 : vector<1x2x256xf32> to vector<2x256xf32>
    %243 = vector.extract_strided_slice %53 {offsets = [0, 3], sizes = [2, 253], strides = [1, 1]} : vector<2x256xf32> to vector<2x253xf32>
    %244 = vector.extract_strided_slice %53 {offsets = [0, 0], sizes = [2, 3], strides = [1, 1]} : vector<2x256xf32> to vector<2x3xf32>
    %245 = tpu.concatenate %243, %244 in 1 : vector<2x253xf32>, vector<2x3xf32> -> vector<2x256xf32>
    %246 = arith.mulf %242, %245 : vector<2x256xf32>
    %247 = arith.addf %240, %246 : vector<2x256xf32>
    %c28 = arith.constant 28 : index
    %c0_83 = arith.constant 0 : index
    %c0_84 = arith.constant 0 : index
    %248 = vector.load %arg6[%c28, %c0_83, %c0_84] : memref<49x2x256xf32, #tpu.memory_space<vmem>>, vector<1x2x256xf32>
    %249 = vector.shape_cast %248 : vector<1x2x256xf32> to vector<2x256xf32>
    %250 = vector.extract_strided_slice %53 {offsets = [0, 13], sizes = [2, 243], strides = [1, 1]} : vector<2x256xf32> to vector<2x243xf32>
    %251 = vector.extract_strided_slice %53 {offsets = [0, 0], sizes = [2, 13], strides = [1, 1]} : vector<2x256xf32> to vector<2x13xf32>
    %252 = tpu.concatenate %250, %251 in 1 : vector<2x243xf32>, vector<2x13xf32> -> vector<2x256xf32>
    %253 = arith.mulf %249, %252 : vector<2x256xf32>
    %254 = arith.addf %247, %253 : vector<2x256xf32>
    %c29 = arith.constant 29 : index
    %c0_85 = arith.constant 0 : index
    %c0_86 = arith.constant 0 : index
    %255 = vector.load %arg6[%c29, %c0_85, %c0_86] : memref<49x2x256xf32, #tpu.memory_space<vmem>>, vector<1x2x256xf32>
    %256 = vector.shape_cast %255 : vector<1x2x256xf32> to vector<2x256xf32>
    %257 = vector.extract_strided_slice %53 {offsets = [0, 14], sizes = [2, 242], strides = [1, 1]} : vector<2x256xf32> to vector<2x242xf32>
    %258 = vector.extract_strided_slice %53 {offsets = [0, 0], sizes = [2, 14], strides = [1, 1]} : vector<2x256xf32> to vector<2x14xf32>
    %259 = tpu.concatenate %257, %258 in 1 : vector<2x242xf32>, vector<2x14xf32> -> vector<2x256xf32>
    %260 = arith.mulf %256, %259 : vector<2x256xf32>
    %261 = arith.addf %254, %260 : vector<2x256xf32>
    %c30 = arith.constant 30 : index
    %c0_87 = arith.constant 0 : index
    %c0_88 = arith.constant 0 : index
    %262 = vector.load %arg6[%c30, %c0_87, %c0_88] : memref<49x2x256xf32, #tpu.memory_space<vmem>>, vector<1x2x256xf32>
    %263 = vector.shape_cast %262 : vector<1x2x256xf32> to vector<2x256xf32>
    %264 = vector.extract_strided_slice %53 {offsets = [0, 15], sizes = [2, 241], strides = [1, 1]} : vector<2x256xf32> to vector<2x241xf32>
    %265 = vector.extract_strided_slice %53 {offsets = [0, 0], sizes = [2, 15], strides = [1, 1]} : vector<2x256xf32> to vector<2x15xf32>
    %266 = tpu.concatenate %264, %265 in 1 : vector<2x241xf32>, vector<2x15xf32> -> vector<2x256xf32>
    %267 = arith.mulf %263, %266 : vector<2x256xf32>
    %268 = arith.addf %261, %267 : vector<2x256xf32>
    %c31 = arith.constant 31 : index
    %c0_89 = arith.constant 0 : index
    %c0_90 = arith.constant 0 : index
    %269 = vector.load %arg6[%c31, %c0_89, %c0_90] : memref<49x2x256xf32, #tpu.memory_space<vmem>>, vector<1x2x256xf32>
    %270 = vector.shape_cast %269 : vector<1x2x256xf32> to vector<2x256xf32>
    %271 = vector.extract_strided_slice %53 {offsets = [0, 16], sizes = [2, 240], strides = [1, 1]} : vector<2x256xf32> to vector<2x240xf32>
    %272 = vector.extract_strided_slice %53 {offsets = [0, 0], sizes = [2, 16], strides = [1, 1]} : vector<2x256xf32> to vector<2x16xf32>
    %273 = tpu.concatenate %271, %272 in 1 : vector<2x240xf32>, vector<2x16xf32> -> vector<2x256xf32>
    %274 = arith.mulf %270, %273 : vector<2x256xf32>
    %275 = arith.addf %268, %274 : vector<2x256xf32>
    %c32 = arith.constant 32 : index
    %c0_91 = arith.constant 0 : index
    %c0_92 = arith.constant 0 : index
    %276 = vector.load %arg6[%c32, %c0_91, %c0_92] : memref<49x2x256xf32, #tpu.memory_space<vmem>>, vector<1x2x256xf32>
    %277 = vector.shape_cast %276 : vector<1x2x256xf32> to vector<2x256xf32>
    %278 = vector.extract_strided_slice %53 {offsets = [0, 17], sizes = [2, 239], strides = [1, 1]} : vector<2x256xf32> to vector<2x239xf32>
    %279 = vector.extract_strided_slice %53 {offsets = [0, 0], sizes = [2, 17], strides = [1, 1]} : vector<2x256xf32> to vector<2x17xf32>
    %280 = tpu.concatenate %278, %279 in 1 : vector<2x239xf32>, vector<2x17xf32> -> vector<2x256xf32>
    %281 = arith.mulf %277, %280 : vector<2x256xf32>
    %282 = arith.addf %275, %281 : vector<2x256xf32>
    %c33 = arith.constant 33 : index
    %c0_93 = arith.constant 0 : index
    %c0_94 = arith.constant 0 : index
    %283 = vector.load %arg6[%c33, %c0_93, %c0_94] : memref<49x2x256xf32, #tpu.memory_space<vmem>>, vector<1x2x256xf32>
    %284 = vector.shape_cast %283 : vector<1x2x256xf32> to vector<2x256xf32>
    %285 = vector.extract_strided_slice %53 {offsets = [0, 18], sizes = [2, 238], strides = [1, 1]} : vector<2x256xf32> to vector<2x238xf32>
    %286 = vector.extract_strided_slice %53 {offsets = [0, 0], sizes = [2, 18], strides = [1, 1]} : vector<2x256xf32> to vector<2x18xf32>
    %287 = tpu.concatenate %285, %286 in 1 : vector<2x238xf32>, vector<2x18xf32> -> vector<2x256xf32>
    %288 = arith.mulf %284, %287 : vector<2x256xf32>
    %289 = arith.addf %282, %288 : vector<2x256xf32>
    %c34 = arith.constant 34 : index
    %c0_95 = arith.constant 0 : index
    %c0_96 = arith.constant 0 : index
    %290 = vector.load %arg6[%c34, %c0_95, %c0_96] : memref<49x2x256xf32, #tpu.memory_space<vmem>>, vector<1x2x256xf32>
    %291 = vector.shape_cast %290 : vector<1x2x256xf32> to vector<2x256xf32>
    %292 = vector.extract_strided_slice %53 {offsets = [0, 19], sizes = [2, 237], strides = [1, 1]} : vector<2x256xf32> to vector<2x237xf32>
    %293 = vector.extract_strided_slice %53 {offsets = [0, 0], sizes = [2, 19], strides = [1, 1]} : vector<2x256xf32> to vector<2x19xf32>
    %294 = tpu.concatenate %292, %293 in 1 : vector<2x237xf32>, vector<2x19xf32> -> vector<2x256xf32>
    %295 = arith.mulf %291, %294 : vector<2x256xf32>
    %296 = arith.addf %289, %295 : vector<2x256xf32>
    %c35 = arith.constant 35 : index
    %c0_97 = arith.constant 0 : index
    %c0_98 = arith.constant 0 : index
    %297 = vector.load %arg6[%c35, %c0_97, %c0_98] : memref<49x2x256xf32, #tpu.memory_space<vmem>>, vector<1x2x256xf32>
    %298 = vector.shape_cast %297 : vector<1x2x256xf32> to vector<2x256xf32>
    %299 = vector.extract_strided_slice %53 {offsets = [0, 29], sizes = [2, 227], strides = [1, 1]} : vector<2x256xf32> to vector<2x227xf32>
    %300 = vector.extract_strided_slice %53 {offsets = [0, 0], sizes = [2, 29], strides = [1, 1]} : vector<2x256xf32> to vector<2x29xf32>
    %301 = tpu.concatenate %299, %300 in 1 : vector<2x227xf32>, vector<2x29xf32> -> vector<2x256xf32>
    %302 = arith.mulf %298, %301 : vector<2x256xf32>
    %303 = arith.addf %296, %302 : vector<2x256xf32>
    %c36 = arith.constant 36 : index
    %c0_99 = arith.constant 0 : index
    %c0_100 = arith.constant 0 : index
    %304 = vector.load %arg6[%c36, %c0_99, %c0_100] : memref<49x2x256xf32, #tpu.memory_space<vmem>>, vector<1x2x256xf32>
    %305 = vector.shape_cast %304 : vector<1x2x256xf32> to vector<2x256xf32>
    %306 = vector.extract_strided_slice %53 {offsets = [0, 30], sizes = [2, 226], strides = [1, 1]} : vector<2x256xf32> to vector<2x226xf32>
    %307 = vector.extract_strided_slice %53 {offsets = [0, 0], sizes = [2, 30], strides = [1, 1]} : vector<2x256xf32> to vector<2x30xf32>
    %308 = tpu.concatenate %306, %307 in 1 : vector<2x226xf32>, vector<2x30xf32> -> vector<2x256xf32>
    %309 = arith.mulf %305, %308 : vector<2x256xf32>
    %310 = arith.addf %303, %309 : vector<2x256xf32>
    %c37 = arith.constant 37 : index
    %c0_101 = arith.constant 0 : index
    %c0_102 = arith.constant 0 : index
    %311 = vector.load %arg6[%c37, %c0_101, %c0_102] : memref<49x2x256xf32, #tpu.memory_space<vmem>>, vector<1x2x256xf32>
    %312 = vector.shape_cast %311 : vector<1x2x256xf32> to vector<2x256xf32>
    %313 = vector.extract_strided_slice %53 {offsets = [0, 31], sizes = [2, 225], strides = [1, 1]} : vector<2x256xf32> to vector<2x225xf32>
    %314 = vector.extract_strided_slice %53 {offsets = [0, 0], sizes = [2, 31], strides = [1, 1]} : vector<2x256xf32> to vector<2x31xf32>
    %315 = tpu.concatenate %313, %314 in 1 : vector<2x225xf32>, vector<2x31xf32> -> vector<2x256xf32>
    %316 = arith.mulf %312, %315 : vector<2x256xf32>
    %317 = arith.addf %310, %316 : vector<2x256xf32>
    %c38 = arith.constant 38 : index
    %c0_103 = arith.constant 0 : index
    %c0_104 = arith.constant 0 : index
    %318 = vector.load %arg6[%c38, %c0_103, %c0_104] : memref<49x2x256xf32, #tpu.memory_space<vmem>>, vector<1x2x256xf32>
    %319 = vector.shape_cast %318 : vector<1x2x256xf32> to vector<2x256xf32>
    %320 = vector.extract_strided_slice %53 {offsets = [0, 32], sizes = [2, 224], strides = [1, 1]} : vector<2x256xf32> to vector<2x224xf32>
    %321 = vector.extract_strided_slice %53 {offsets = [0, 0], sizes = [2, 32], strides = [1, 1]} : vector<2x256xf32> to vector<2x32xf32>
    %322 = tpu.concatenate %320, %321 in 1 : vector<2x224xf32>, vector<2x32xf32> -> vector<2x256xf32>
    %323 = arith.mulf %319, %322 : vector<2x256xf32>
    %324 = arith.addf %317, %323 : vector<2x256xf32>
    %c39 = arith.constant 39 : index
    %c0_105 = arith.constant 0 : index
    %c0_106 = arith.constant 0 : index
    %325 = vector.load %arg6[%c39, %c0_105, %c0_106] : memref<49x2x256xf32, #tpu.memory_space<vmem>>, vector<1x2x256xf32>
    %326 = vector.shape_cast %325 : vector<1x2x256xf32> to vector<2x256xf32>
    %327 = vector.extract_strided_slice %53 {offsets = [0, 33], sizes = [2, 223], strides = [1, 1]} : vector<2x256xf32> to vector<2x223xf32>
    %328 = vector.extract_strided_slice %53 {offsets = [0, 0], sizes = [2, 33], strides = [1, 1]} : vector<2x256xf32> to vector<2x33xf32>
    %329 = tpu.concatenate %327, %328 in 1 : vector<2x223xf32>, vector<2x33xf32> -> vector<2x256xf32>
    %330 = arith.mulf %326, %329 : vector<2x256xf32>
    %331 = arith.addf %324, %330 : vector<2x256xf32>
    %c40 = arith.constant 40 : index
    %c0_107 = arith.constant 0 : index
    %c0_108 = arith.constant 0 : index
    %332 = vector.load %arg6[%c40, %c0_107, %c0_108] : memref<49x2x256xf32, #tpu.memory_space<vmem>>, vector<1x2x256xf32>
    %333 = vector.shape_cast %332 : vector<1x2x256xf32> to vector<2x256xf32>
    %334 = vector.extract_strided_slice %53 {offsets = [0, 34], sizes = [2, 222], strides = [1, 1]} : vector<2x256xf32> to vector<2x222xf32>
    %335 = vector.extract_strided_slice %53 {offsets = [0, 0], sizes = [2, 34], strides = [1, 1]} : vector<2x256xf32> to vector<2x34xf32>
    %336 = tpu.concatenate %334, %335 in 1 : vector<2x222xf32>, vector<2x34xf32> -> vector<2x256xf32>
    %337 = arith.mulf %333, %336 : vector<2x256xf32>
    %338 = arith.addf %331, %337 : vector<2x256xf32>
    %c41 = arith.constant 41 : index
    %c0_109 = arith.constant 0 : index
    %c0_110 = arith.constant 0 : index
    %339 = vector.load %arg6[%c41, %c0_109, %c0_110] : memref<49x2x256xf32, #tpu.memory_space<vmem>>, vector<1x2x256xf32>
    %340 = vector.shape_cast %339 : vector<1x2x256xf32> to vector<2x256xf32>
    %341 = vector.extract_strided_slice %53 {offsets = [0, 35], sizes = [2, 221], strides = [1, 1]} : vector<2x256xf32> to vector<2x221xf32>
    %342 = vector.extract_strided_slice %53 {offsets = [0, 0], sizes = [2, 35], strides = [1, 1]} : vector<2x256xf32> to vector<2x35xf32>
    %343 = tpu.concatenate %341, %342 in 1 : vector<2x221xf32>, vector<2x35xf32> -> vector<2x256xf32>
    %344 = arith.mulf %340, %343 : vector<2x256xf32>
    %345 = arith.addf %338, %344 : vector<2x256xf32>
    %c42 = arith.constant 42 : index
    %c0_111 = arith.constant 0 : index
    %c0_112 = arith.constant 0 : index
    %346 = vector.load %arg6[%c42, %c0_111, %c0_112] : memref<49x2x256xf32, #tpu.memory_space<vmem>>, vector<1x2x256xf32>
    %347 = vector.shape_cast %346 : vector<1x2x256xf32> to vector<2x256xf32>
    %348 = vector.extract_strided_slice %53 {offsets = [0, 45], sizes = [2, 211], strides = [1, 1]} : vector<2x256xf32> to vector<2x211xf32>
    %349 = vector.extract_strided_slice %53 {offsets = [0, 0], sizes = [2, 45], strides = [1, 1]} : vector<2x256xf32> to vector<2x45xf32>
    %350 = tpu.concatenate %348, %349 in 1 : vector<2x211xf32>, vector<2x45xf32> -> vector<2x256xf32>
    %351 = arith.mulf %347, %350 : vector<2x256xf32>
    %352 = arith.addf %345, %351 : vector<2x256xf32>
    %c43 = arith.constant 43 : index
    %c0_113 = arith.constant 0 : index
    %c0_114 = arith.constant 0 : index
    %353 = vector.load %arg6[%c43, %c0_113, %c0_114] : memref<49x2x256xf32, #tpu.memory_space<vmem>>, vector<1x2x256xf32>
    %354 = vector.shape_cast %353 : vector<1x2x256xf32> to vector<2x256xf32>
    %355 = vector.extract_strided_slice %53 {offsets = [0, 46], sizes = [2, 210], strides = [1, 1]} : vector<2x256xf32> to vector<2x210xf32>
    %356 = vector.extract_strided_slice %53 {offsets = [0, 0], sizes = [2, 46], strides = [1, 1]} : vector<2x256xf32> to vector<2x46xf32>
    %357 = tpu.concatenate %355, %356 in 1 : vector<2x210xf32>, vector<2x46xf32> -> vector<2x256xf32>
    %358 = arith.mulf %354, %357 : vector<2x256xf32>
    %359 = arith.addf %352, %358 : vector<2x256xf32>
    %c44 = arith.constant 44 : index
    %c0_115 = arith.constant 0 : index
    %c0_116 = arith.constant 0 : index
    %360 = vector.load %arg6[%c44, %c0_115, %c0_116] : memref<49x2x256xf32, #tpu.memory_space<vmem>>, vector<1x2x256xf32>
    %361 = vector.shape_cast %360 : vector<1x2x256xf32> to vector<2x256xf32>
    %362 = vector.extract_strided_slice %53 {offsets = [0, 47], sizes = [2, 209], strides = [1, 1]} : vector<2x256xf32> to vector<2x209xf32>
    %363 = vector.extract_strided_slice %53 {offsets = [0, 0], sizes = [2, 47], strides = [1, 1]} : vector<2x256xf32> to vector<2x47xf32>
    %364 = tpu.concatenate %362, %363 in 1 : vector<2x209xf32>, vector<2x47xf32> -> vector<2x256xf32>
    %365 = arith.mulf %361, %364 : vector<2x256xf32>
    %366 = arith.addf %359, %365 : vector<2x256xf32>
    %c45 = arith.constant 45 : index
    %c0_117 = arith.constant 0 : index
    %c0_118 = arith.constant 0 : index
    %367 = vector.load %arg6[%c45, %c0_117, %c0_118] : memref<49x2x256xf32, #tpu.memory_space<vmem>>, vector<1x2x256xf32>
    %368 = vector.shape_cast %367 : vector<1x2x256xf32> to vector<2x256xf32>
    %369 = vector.extract_strided_slice %53 {offsets = [0, 48], sizes = [2, 208], strides = [1, 1]} : vector<2x256xf32> to vector<2x208xf32>
    %370 = vector.extract_strided_slice %53 {offsets = [0, 0], sizes = [2, 48], strides = [1, 1]} : vector<2x256xf32> to vector<2x48xf32>
    %371 = tpu.concatenate %369, %370 in 1 : vector<2x208xf32>, vector<2x48xf32> -> vector<2x256xf32>
    %372 = arith.mulf %368, %371 : vector<2x256xf32>
    %373 = arith.addf %366, %372 : vector<2x256xf32>
    %c46 = arith.constant 46 : index
    %c0_119 = arith.constant 0 : index
    %c0_120 = arith.constant 0 : index
    %374 = vector.load %arg6[%c46, %c0_119, %c0_120] : memref<49x2x256xf32, #tpu.memory_space<vmem>>, vector<1x2x256xf32>
    %375 = vector.shape_cast %374 : vector<1x2x256xf32> to vector<2x256xf32>
    %376 = vector.extract_strided_slice %53 {offsets = [0, 49], sizes = [2, 207], strides = [1, 1]} : vector<2x256xf32> to vector<2x207xf32>
    %377 = vector.extract_strided_slice %53 {offsets = [0, 0], sizes = [2, 49], strides = [1, 1]} : vector<2x256xf32> to vector<2x49xf32>
    %378 = tpu.concatenate %376, %377 in 1 : vector<2x207xf32>, vector<2x49xf32> -> vector<2x256xf32>
    %379 = arith.mulf %375, %378 : vector<2x256xf32>
    %380 = arith.addf %373, %379 : vector<2x256xf32>
    %c47 = arith.constant 47 : index
    %c0_121 = arith.constant 0 : index
    %c0_122 = arith.constant 0 : index
    %381 = vector.load %arg6[%c47, %c0_121, %c0_122] : memref<49x2x256xf32, #tpu.memory_space<vmem>>, vector<1x2x256xf32>
    %382 = vector.shape_cast %381 : vector<1x2x256xf32> to vector<2x256xf32>
    %383 = vector.extract_strided_slice %53 {offsets = [0, 50], sizes = [2, 206], strides = [1, 1]} : vector<2x256xf32> to vector<2x206xf32>
    %384 = vector.extract_strided_slice %53 {offsets = [0, 0], sizes = [2, 50], strides = [1, 1]} : vector<2x256xf32> to vector<2x50xf32>
    %385 = tpu.concatenate %383, %384 in 1 : vector<2x206xf32>, vector<2x50xf32> -> vector<2x256xf32>
    %386 = arith.mulf %382, %385 : vector<2x256xf32>
    %387 = arith.addf %380, %386 : vector<2x256xf32>
    %c48 = arith.constant 48 : index
    %c0_123 = arith.constant 0 : index
    %c0_124 = arith.constant 0 : index
    %388 = vector.load %arg6[%c48, %c0_123, %c0_124] : memref<49x2x256xf32, #tpu.memory_space<vmem>>, vector<1x2x256xf32>
    %389 = vector.shape_cast %388 : vector<1x2x256xf32> to vector<2x256xf32>
    %390 = vector.extract_strided_slice %53 {offsets = [0, 51], sizes = [2, 205], strides = [1, 1]} : vector<2x256xf32> to vector<2x205xf32>
    %391 = vector.extract_strided_slice %53 {offsets = [0, 0], sizes = [2, 51], strides = [1, 1]} : vector<2x256xf32> to vector<2x51xf32>
    %392 = tpu.concatenate %390, %391 in 1 : vector<2x205xf32>, vector<2x51xf32> -> vector<2x256xf32>
    %393 = arith.mulf %389, %392 : vector<2x256xf32>
    %394 = arith.addf %387, %393 : vector<2x256xf32>
    %cst_125 = arith.constant dense<0.000000e+00> : vector<256xf32>
    %395 = vector.multi_reduction <add>, %394, %cst_125 [0] : vector<2x256xf32> to vector<256xf32>
    %396 = vector.shape_cast %395 : vector<256xf32> to vector<1x256xf32>
    %397 = vector.broadcast %4 : f32 to vector<1x256xf32>
    %398 = arith.addf %396, %397 : vector<1x256xf32>
    %cst_126 = arith.constant 0.000000e+00 : f32
    %399 = vector.broadcast %cst_126 : f32 to vector<1x256xf32>
    %400 = arith.subf %399, %398 : vector<1x256xf32>
    %401 = math.exp %400 : vector<1x256xf32>
    %cst_127 = arith.constant 1.000000e+00 : f32
    %402 = vector.broadcast %cst_127 : f32 to vector<1x256xf32>
    %403 = arith.addf %402, %401 : vector<1x256xf32>
    %cst_128 = arith.constant 1.000000e+00 : f32
    %404 = vector.broadcast %cst_128 : f32 to vector<1x256xf32>
    %405 = arith.divf %404, %403 : vector<1x256xf32>
    %406 = vector.broadcast %405 : vector<1x256xf32> to vector<32x256xf32>
    %407 = arith.mulf %46, %406 : vector<32x256xf32>
    %c0_129 = arith.constant 0 : index
    %c0_130 = arith.constant 0 : index
    %c0_131 = arith.constant 0 : index
    %408 = vector.load %arg8[%c0_129, %c0_130, %c0_131] : memref<1x32x256xf32, #tpu.memory_space<vmem>>, vector<1x32x256xf32>
    %409 = vector.shape_cast %408 : vector<1x32x256xf32> to vector<32x256xf32>
    %410 = vector.shape_cast %407 : vector<32x256xf32> to vector<1x32x256xf32>
    tpu.vector_store %arg8[%c0_129, %c0_130, %c0_131], %410 {strides = array<i32>} : memref<1x32x256xf32, #tpu.memory_space<vmem>>, vector<1x32x256xf32>,
    return
  }
  func.func @transform_0(%arg0: i32) -> (i32, i32, i32) {
    %c0_i32 = arith.constant 0 : i32
    %c0_i32_0 = arith.constant 0 : i32
    %c0_i32_1 = arith.constant 0 : i32
    return %arg0, %c0_i32, %c0_i32_0 : i32, i32, i32
  }
  func.func @transform_1(%arg0: i32) -> (i32, i32) {
    %c0_i32 = arith.constant 0 : i32
    %c0_i32_0 = arith.constant 0 : i32
    %c0_i32_1 = arith.constant 0 : i32
    return %c0_i32, %c0_i32_0 : i32, i32
  }
  func.func @transform_2(%arg0: i32) -> (i32, i32) {
    %c0_i32 = arith.constant 0 : i32
    %c0_i32_0 = arith.constant 0 : i32
    %c0_i32_1 = arith.constant 0 : i32
    return %c0_i32, %c0_i32_0 : i32, i32
  }
  func.func @transform_3(%arg0: i32) -> (i32, i32) {
    %c0_i32 = arith.constant 0 : i32
    %c0_i32_0 = arith.constant 0 : i32
    %c0_i32_1 = arith.constant 0 : i32
    return %c0_i32, %c0_i32_0 : i32, i32
  }
  func.func @transform_4(%arg0: i32) -> (i32, i32) {
    %c0_i32 = arith.constant 0 : i32
    %c0_i32_0 = arith.constant 0 : i32
    %c0_i32_1 = arith.constant 0 : i32
    return %c0_i32, %c0_i32_0 : i32, i32
  }
  func.func @transform_5(%arg0: i32) -> (i32, i32, i32) {
    %c0_i32 = arith.constant 0 : i32
    %c0_i32_0 = arith.constant 0 : i32
    %c0_i32_1 = arith.constant 0 : i32
    %c0_i32_2 = arith.constant 0 : i32
    return %c0_i32, %c0_i32_0, %c0_i32_1 : i32, i32, i32
  }
  func.func @transform_6(%arg0: i32) -> i32 {
    %c0_i32 = arith.constant 0 : i32
    %c0_i32_0 = arith.constant 0 : i32
    return %c0_i32 : i32
  }
  func.func @transform_7(%arg0: i32) -> (i32, i32, i32) {
    %c0_i32 = arith.constant 0 : i32
    %c0_i32_0 = arith.constant 0 : i32
    %c0_i32_1 = arith.constant 0 : i32
    return %arg0, %c0_i32, %c0_i32_0 : i32, i32, i32
  }
}

</mosaic_0001>

<bundles_post_ra>
// kernel: tpu_custom_call.1
= control target key start
LH: loop header
LB: loop body
LE: loop exit
PB: predicated region body
PF: predicated region fallthrough
CT: control target
= control target key end

     0   :  { %6 = vsyncpa [#allocation3], 0  ;;  %s128_s0 = inlined_call_operand.hbm [shape: f32[8,128], index: 0, kind: input, shape index: {}]   ;;  %s129_s1 = inlined_call_operand.hbm [shape: f32[8,128], index: 1, kind: output, shape index: {}]  }
   0x1   :  { %7 = vsyncpa [#allocation4], 0  ;;  %s91_s6 = smov [#allocation2]   ;;  %s43_s10 = scalar_lea.hbm %s128_s0, 128 }
   0x2   :  { %s14_s7 = sshll.u32 %s91_s6, 4  ;;  %p44_p0 = scmp.ne.s32.totalorder %s128_s0, %s43_s10  ;;  %s15_s7 = int_to_ptr.vmem [resolvable:$true] %s14_s7 }
   0x3   :  { %p47_p1 = scmp.lt.u32.totalorder %s43_s10, %s128_s0 }
   0x5   :  { %p49_p2 = pnand %p47_p1, %p44_p0 }
   0x7   :  { %52 = shalt.err (!%p49_p2)
}
   0x8   :  { %s53_s15 = scalar_lea.vmem %s15_s7, 128  ;;  %p58_p4 = scmp.lt.s32.totalorder %s15_s7, %s15_s7 }
   0x9   :  { %p54_p3 = scmp.ne.s32.totalorder %s15_s7, %s53_s15  ;;  %p59_p5 = scmp.lt.s32.totalorder %s53_s15, %s53_s15 }
   0xb   :  { %p60_p6 = por %p59_p5, %p58_p4 }
   0xd   :  { %p61_p7 = pnand %p60_p6, %p54_p3 }
   0xf   :  { %64 = shalt.err (!%p61_p7)
}
  0x10   :  { %17 = dma.hbm_to_vmem [thread:$0]  %s128_s0, 128, %s15_s7, [#allocation3]  }
  0x11   :  { %87 = dma.done.wait [#allocation3], 128  }
  0x12   :  { %88 = vsyncadd [#allocation3], 4294967168  ;;  %v21_v0 = vld [vmem:[#allocation2] sm:$0xff]  ;;  %s92_s18 = smov 1   ;;  %s93_s19 = smov [#allocation5]  }
  0x13   :  { %22 = vrot.lane.b32.xlu0 %v21_v0, %s92_s18  ;;  %s31_s20 = sshll.u32 %s93_s19, 4  ;;  %s32_s20 = int_to_ptr.vmem [resolvable:$true] %s31_s20 }
  0x14   :  { %s65_s21 = scalar_lea.vmem %s32_s20, 128  ;;  %p70_p9 = scmp.lt.s32.totalorder %s32_s20, %s32_s20 }
  0x15   :  { %p66_p8 = scmp.ne.s32.totalorder %s32_s20, %s65_s21  ;;  %p71_p10 = scmp.lt.s32.totalorder %s65_s21, %s65_s21 }
  0x17   :  { %p72_p11 = por %p71_p10, %p70_p9 }
  0x19   :  { %p73_p12 = pnand %p72_p11, %p66_p8 }
  0x85   :  { %v23_v1 = vpop.permute.xlu0 %22 }
  0x86   :  { %24 = vst [vmem:[#allocation5] sm:$0xff] %v23_v1 }
  0x87   :  { %76 = shalt.err (!%p73_p12)
}
  0x88   :  { %s77_s0 = scalar_lea.hbm %s129_s1, 128 }
  0x89   :  { %p78_p13 = scmp.ne.s32.totalorder %s129_s1, %s77_s0  ;;  %p81_p0 = scmp.lt.u32.totalorder %s77_s0, %s129_s1 }
  0x8b   :  { %p83_p1 = pnand %p81_p0, %p78_p13 }
  0x8d   :  { %86 = shalt.err (!%p83_p1)
}
  0x8e   :  { %34 = dma.vmem_to_hbm [thread:$0]  %s32_s20, 128, %s129_s1, [#allocation4]  }
  0x8f   :  { %89 = dma.done.wait [#allocation4], 128  }
  0x90   :  { %90 = vsyncadd [#allocation4], 4294967168 }
  0x91   :  { %38 = vsyncpa [#allocation3], 1 }
  0x92   :  { %39 = vsyncpa [#allocation4], 1 }

// kernel: tpu_custom_call.1
= control target key start
LH: loop header
LB: loop body
LE: loop exit
PB: predicated region body
PF: predicated region fallthrough
CT: control target
= control target key end

     0   :  { %s2925_s0 = inlined_call_operand.hbm [shape: f32[2,32,256], index: 0, kind: input, shape index: {}]   ;;  %s2926_s1 = inlined_call_operand.vmem [shape: f32[32,2], index: 1, kind: input, shape index: {}]   ;;  %s2927_s2 = inlined_call_operand.vmem [shape: f32[1,2], index: 2, kind: input, shape index: {}]   ;;  %s2928_s3 = inlined_call_operand.vmem [shape: f32[32,2], index: 3, kind: input, shape index: {}]   ;;  %s2929_s4 = inlined_call_operand.vmem [shape: f32[32,1], index: 4, kind: input, shape index: {}]   ;;  %s2930_s5 = inlined_call_operand.hbm [shape: f32[49,2,256], index: 5, kind: input, shape index: {}]   ;;  %s2931_s6 = inlined_call_operand.<no memory space> [shape: f32[1], index: 6, kind: input, shape index: {}]   ;;  %s2932_s7 = inlined_call_operand.hbm [shape: f32[2,32,256], index: 7, kind: output, shape index: {}]  }
   0x1   :  { %12 = sst [smem:[#allocation2]] %s2931_s6 }
   0x2   :  { %13 = vsyncpa [#allocation4], 0 }
   0x3   :  { %15 = vsyncpa [#allocation4 + $0x1], 0 }
   0x4   :  { %16 = vsyncpa [#allocation7], 0 }
   0x5   :  { %17 = vsyncpa [#allocation5], 0 }
   0x6   :  { %19 = vsyncpa [#allocation5 + $0x1], 0  ;;  %s2207_s26 = smov 0   ;;  %s2209_s27 = smov 0  }
   0x7   :  { %s2211_s28 = smov 0   ;;  %s2213_s29 = smov 0  }
   0x8 LB: > { %s2228_s6 = sadd.s32 4294967295, %s2104_s29   ;;  %s1820_s30 = sadd.s32 4294967294, %s2104_s29   ;;  %s2104_s29 = sphi %s2213_s29, %s2952_s29   ;;  %s2100_s28 = sphi %s2211_s28, %s2951_s28   ;;  %s2096_s27 = sphi %s2209_s27, %s2950_s27   ;;  %s2092_s26 = sphi %s2207_s26, %s2949_s26  }
   0x9   : > { %p45_p0 = scmp.ne.s32.totalorder %s2096_s27, %s2092_s26  ;;  %p2933_p1 = scmp.eq.s32.totalorder %s2228_s6, 0 }
   0xa   : > { %p201_p3 = scmp.eq.s32.totalorder %s1820_s30, 1  ;;  %p1821_p5 = scmp.ge.s32.totalorder %s2104_s29, 1 }
   0xb   : > { %p2237_p4 = por %p2933_p1, %p45_p0  ;;  %p208_p7 = scmp.lt.s32.totalorder %s2104_s29, 3 }
   0xc   : > { %p2242_p6 = por %p201_p3, %p45_p0  ;;  %s2106_s11 = smov [#allocation6]  }
   0xd   : > { %s2936_s8 = scalar_select %p2237_p4, 1, 0 }
   0xe   : > { %s2937_s9 = scalar_select %p2242_p6, 1, 0 }
   0xf   : > { %p2247_p8 = pnand %p1821_p5, %p208_p7  ;;  %s232_s12 = sshll.u32 %s2106_s11, 4  ;;  %s2251_s12 = int_to_ptr.vmem [resolvable:$true] %s232_s12 }
  0x10   : > { %s2263_s14 = sadd.s32 1, %s2104_s29   ;;  %s32_s15 = sadd.s32 1, %s2100_s28 }
  0x11   : > { %s2938_s10 = scalar_select %p2247_p8, 1, 0 }
  0x12   : > { %p1846_p9 = pneg %p2247_p8  ;;  %s29_s16 = ssub.s32 %s2104_s29, %s2263_s14 }
  0x13   : > { %s1976_s19 = scalar_lea.hbm %s2930_s5, 3136 }
  0x14   : > { %p2258_p11 = pnand %p1846_p9, %p2933_p1  ;;  %p1977_p12 = scmp.ne.s32.totalorder %s2930_s5, %s1976_s19 }
  0x15   : > { %p1983_p5 = scmp.lt.u32.totalorder %s1976_s19, %s2930_s5 }
  0x16   : > { %p1978_p13 = pneg %p2258_p11 }
  0x18   : > { %p1979_p0 = pnand %p1978_p13, %p1977_p12 }
  0x1a   : > { %p1980_p3 = pneg %p1979_p0 }
  0x1c   : > { %p1985_p7 = pnand %p1983_p5, %p1980_p3 }
  0x1e   : > { %1988 = shalt.err (!%p1985_p7)
}
  0x1f   : > { %s1989_s24 = scalar_lea.vmem %s2251_s12, 3136  ;;  %p1997_p2 = scmp.lt.s32.totalorder %s2251_s12, %s2251_s12 }
  0x20   : > { %p1990_p9 = scmp.ne.s32.totalorder %s2251_s12, %s1989_s24  ;;  %p1998_p6 = scmp.lt.s32.totalorder %s1989_s24, %s1989_s24 }
  0x22   : > { %p1992_p10 = pnand %p1990_p9, %p1978_p13  ;;  %p1999_p4 = por %p1998_p6, %p1997_p2 }
  0x24   : > { %p1993_p1 = pneg %p1992_p10 }
  0x26   : > { %p2000_p8 = pnand %p1999_p4, %p1993_p1 }
  0x28   : > { %2003 = shalt.err (!%p2000_p8)
}
  0x29   : > { %s2107_s25 = smov 64   ;;  %s2108_s30 = smov 4  }
  0x2a   : > { %1849 = dma.hbm_to_vmem [thread:$0]  (!%p2258_p11), %s2930_s5, 3136, %s2251_s12, [#allocation7], %s2107_s25, %s2107_s25, %s2108_s30  }
  0x2b   : > { %p30_p2 = scmp.eq.s32.totalorder %s29_s16, 0  ;;  %p39_p1 = scmp.ne.s32.totalorder %s2100_s28, %s2096_s27 }
  0x2c   : > { %p40_p4 = scmp.eq.s32.totalorder %s2104_s29, 0  ;;  %p1859_p6 = scmp.lt.s32.totalorder %s2104_s29, 2 }
  0x2d   : > { %s2294_s18 = scalar_select %p30_p2, %s2100_s28, %s32_s15  }
  0x2e   : > { %p41_p8 = por %p40_p4, %p39_p1  ;;  %p2940_p10 = scmp.eq.s32.totalorder %s2228_s6, 1 }
  0x2f   : > { %s249_s20 = sand.u32 1, %s2100_s28   ;;  %s1836_s21 = sshll.u32 %s2104_s29, 10 }
  0x30   : > { %p2298_p12 = por %p2940_p10, %p39_p1  ;;  %s1824_s22 = sshll.u32 %s249_s20, 6 }
  0x31   : > { %s2307_s24 = scalar_lea.hbm %s2925_s0, %s1836_s21  ;;  %s253_s12 = scalar_lea.vmem [#allocation3], %s1824_s22 }
  0x32   : > { %s260_s15 = sshll.u32 %s253_s12, 4  ;;  %p2309_p11 = pnand %p1859_p6, %p41_p8  ;;  %s2313_s15 = int_to_ptr.vmem [resolvable:$true] %s260_s15 }
  0x33   : > { %s2315_s25 = scalar_lea.sflag [#allocation4], %s249_s20  ;;  %s2004_s30 = scalar_lea.hbm %s2307_s24, 1024 }
  0x34   : > { %p2005_p13 = scmp.ne.s32.totalorder %s2307_s24, %s2004_s30  ;;  %p2006_p0 = pneg %p2309_p11 }
  0x35   : > { %s2009_s21 = scalar_lea.hbm %s2925_s0, 2048  ;;  %p2010_p7 = scmp.lt.u32.totalorder %s2307_s24, %s2925_s0 }
  0x36   : > { %p2007_p3 = pnand %p2006_p0, %p2005_p13  ;;  %p2011_p9 = scmp.lt.u32.totalorder %s2009_s21, %s2004_s30 }
  0x37   : > { %p2013_p1 = scmp.lt.u32.totalorder %s2004_s30, %s2307_s24 }
  0x38   : > { %p2008_p5 = pneg %p2007_p3  ;;  %p2012_p2 = por %p2011_p9, %p2010_p7 }
  0x3a   : > { %p2014_p4 = por %p2013_p1, %p2012_p2 }
  0x3c   : > { %p2015_p6 = pnand %p2014_p4, %p2008_p5 }
  0x3e   : > { %2018 = shalt.err (!%p2015_p6)
}
  0x3f   : > { %s2019_s20 = scalar_lea.vmem %s2313_s15, 1024  ;;  %s2109_s23 = smov [#allocation3]  }
  0x40   : > { %p2020_p8 = scmp.ne.s32.totalorder %s2313_s15, %s2019_s20  ;;  %s2024_s12 = sshll.u32 %s2109_s23, 4  ;;  %s2025_s12 = int_to_ptr.vmem [resolvable:$false] %s2024_s12 }
  0x41   : > { %s2026_s11 = scalar_lea.vmem %s2025_s12, 2048  ;;  %p2027_p3 = scmp.lt.s32.totalorder %s2313_s15, %s2025_s12 }
  0x42   : > { %p2022_p10 = pnand %p2020_p8, %p2006_p0  ;;  %p2028_p7 = scmp.lt.s32.totalorder %s2026_s11, %s2019_s20 }
  0x44   : > { %p2023_p13 = pneg %p2022_p10  ;;  %p2029_p9 = por %p2028_p7, %p2027_p3 }
  0x46   : > { %p2030_p2 = pnand %p2029_p9, %p2023_p13 }
  0x48   : > { %2033 = shalt.err (!%p2030_p2)
}
  0x49   : > { %s2110_s30 = smov 256   ;;  %s2111_s17 = smov 16  }
  0x4a   : > { %1853 = dma.hbm_to_vmem [thread:$0]  (!%p2309_p11), %s2307_s24, 1024, %s2313_s15, %s2315_s25, %s2110_s30, %s2110_s30, %s2111_s17  }
  0x4b   : > { %p2943_p0 = scmp.ne.s32.totalorder %s2938_s10, 0 }
  0x4c   : > { %s2346_s21 = sand.u32 (!%p2943_p0), 1, %s2096_s27   ;;  %p2944_p5 = scmp.ne.s32.totalorder (!%p2943_p0), %s2936_s8, 0 }
  0x4d   : > { %272 = sbr.rel (%p2943_p0) target bundleno = 997 (0x3e5), region = 48  ;;  %s1828_s22 = sshll.u32 (!%p2943_p0), %s2346_s21, 6 }
  0x4e   : > { %s275_s13 = scalar_lea.sflag (!%p2943_p0), [#allocation4], %s2346_s21  ;;  %s278_s20 = scalar_lea.vmem (!%p2943_p0), [#allocation3], %s1828_s22 }
  0x54   : > { %2079 = dma.done.wait (%p2944_p5), %s275_s13, 1024  }
  0x55   : > { %2081 = vsyncadd (%p2944_p5), %s275_s13, 4294966272  ;;  %p2945_p11 = scmp.eq.s32.totalorder %s2228_s6, 0 }
  0x57   : > { %2083 = dma.done.wait (%p2945_p11), [#allocation7], 3136   ;;  %p2946_p1 = pmov %p2945_p11 }
  0x58   : > { %v2360_v0 = vld [vmem:[%s278_s20 + $0x20] sm:$0xff]  ;;  %v2362_v1 = vld [vmem:[%s278_s20 + $0x28] sm:$0xff]  ;;  %v2370_v5 = vld [vmem:[%s278_s20 + $0x10] sm:$0xff]  ;;  %vm368_vm0 = vcmask 15360   ;;  %v384_v62 = vlaneseq  ;;  %vm546_vm1 = vcmask 1040384   ;;  %s2113_s8 = smov 51  }
  0x59   : > { %2085 = vsyncadd (%p2946_p1), [#allocation7], 4294964160  ;;  %v2364_v2 = vld [vmem:[%s278_s20] sm:$0xff]  ;;  %v341_v3 = vadd.f32 %v2362_v1, %v2360_v0  ;;  %v2368_v4 = vld [vmem:[%s278_s20 + $0x8] sm:$0xff]  ;;  %v358_v15 = vmax.f32 %v2360_v0, %v2362_v1  ;;  %s2114_s10 = smov 49   ;;  %s2115_s24 = smov 48  }
  0x5a   : > { %v2372_v6 = vld [vmem:[%s278_s20 + $0x18] sm:$0xff]  ;;  %v335_v7 = vadd.f32 %v2368_v4, %v2364_v2  ;;  %v352_v8 = vmax.f32 %v2364_v2, %v2368_v4  ;;  %v2380_v10 = vld [vmem:[%s278_s20 + $0x30] sm:$0xff]  ;;  %v313_v19 = vld [vmem:[%s2926_s1] sm:$0xff]  ;;  %s2116_s15 = smov 47   ;;  %s2117_s16 = smov 50   ;;  %vm557_vm2 = vcmask 416768  }
  0x5b   : > { %342 = vadd.xlane.f32.xlu1 %v341_v3  ;;  %v338_v9 = vadd.f32 %v2372_v6, %v2370_v5  ;;  %v2382_v11 = vld [vmem:[%s278_s20 + $0x38] sm:$0xff]  ;;  %v355_v13 = vmax.f32 %v2370_v5, %v2372_v6  ;;  %v314_v23 = vld [vmem:[%s2926_s1 + $0x8] sm:$0xff]  ;;  %v315_v24 = vld [vmem:[%s2926_s1 + $0x10] sm:$0xff]  ;;  %s2118_s25 = smov 46   ;;  %s2119_s23 = smov 45   ;;  %vm580_vm3 = vcmask 408576  }
  0x5c   : > { %336 = vadd.xlane.f32.xlu0 %v335_v7  ;;  %v344_v12 = vadd.f32 %v2382_v11, %v2380_v10  ;;  %v361_v14 = vmax.f32 %v2380_v10, %v2382_v11  ;;  %v316_v30 = vld [vmem:[%s2926_s1 + $0x18] sm:$0xff]  ;;  %v317_v63 = vld [vmem:[%s2927_s2] sm:$0x1]  ;;  %s2120_s12 = smov 35   ;;  %s2121_s11 = smov 34   ;;  %vm603_vm4 = vcmask 400384  }
  0x5d   : > { %s2122_s30 = smov 33   ;;  %s2123_s17 = smov 32   ;;  %vm626_vm5 = vcmask 392192   ;;  %vm649_vm6 = vcmask 384000   ;;  %vm672_vm7 = vcmask 375808   ;;  %vm695_vm8 = vcmask 367616  }
  0x5e   : > { %s2124_s13 = smov 31   ;;  %s2125_s20 = smov 30   ;;  %vm718_vm9 = vcmask 285696   ;;  %vm741_vm10 = vcmask 277504   ;;  %vm764_vm11 = vcmask 269312   ;;  %vm787_vm12 = vcmask 261120  }
  0x5f   : > { %353 = vmax.xlane.f32.xlu1 %v352_v8  ;;  %vm810_vm13 = vcmask 252928   ;;  %vm833_vm14 = vcmask 244736   ;;  %vm856_vm15 = vcmask 236544  }
  0x60   : > { %339 = vadd.xlane.f32.xlu0 %v338_v9  ;;  %v2415_v9 = vshrl.u32 %v384_v62, 7 }
  0x63   : > { %345 = vadd.xlane.f32.xlu1 %v344_v12 }
  0x64   : > { %356 = vmax.xlane.f32.xlu0 %v355_v13 }
  0x67   : > { %362 = vmax.xlane.f32.xlu1 %v361_v14 }
  0x68   : > { %359 = vmax.xlane.f32.xlu0 %v358_v15  ;;  %v386_v15 = vsub.s32 0, %v2415_v9 }
  0xe8   : > { %v343_v16 = vpop.xlane.xlu1 %342 }
  0xe9   : > { %v337_v17 = vpop.xlane.xlu0 %336  ;;  %v350_v20 = vmul.f32 0.00390625, %v343_v16 }
  0xea   : > { %v348_v18 = vmul.f32 0.00390625, %v337_v17 }
  0xeb   : > { %v366_v29 = vmul.f32 %v350_v20, %v315_v24  ;;  %v319_v20 = vld [vmem:[%s2928_s3 + $0x8] sm:$0xff] }
  0xec   : > { %v354_v21 = vpop.xlane.xlu1 %353  ;;  %v364_v25 = vmul.f32 %v348_v18, %v313_v19 }
  0xed   : > { %v340_v22 = vpop.xlane.xlu0 %339  ;;  %v408_v34 = vmul.f32 %v354_v21, %v313_v19  ;;  %v372_v40 = vsel %vm368_vm0, %v366_v29, 0.0  ;;  %v318_v21 = vld [vmem:[%s2928_s3] sm:$0xff] }
  0xee   : > { %v349_v26 = vmul.f32 0.00390625, %v340_v22  ;;  %v369_v33 = vsel %vm368_vm0, %v364_v25, 0.0 }
  0xef   : > { %v412_v46 = vsel %vm368_vm0, %v408_v34, 0.0 }
  0xf0   : > { %v346_v27 = vpop.xlane.xlu1 %345  ;;  %v365_v28 = vmul.f32 %v349_v26, %v314_v23 }
  0xf1   : > { %v351_v31 = vmul.f32 0.00390625, %v346_v27  ;;  %v357_v32 = vpop.xlane.xlu0 %356 }
  0xf2   : > { %v370_v35 = vsel %vm368_vm0, %v365_v28, 0.0  ;;  %v409_v36 = vmul.f32 %v357_v32, %v314_v23 }
  0xf3   : > { %v371_v37 = vadd.f32 %v370_v35, %v369_v33  ;;  %v367_v38 = vmul.f32 %v351_v31, %v316_v30  ;;  %v321_v33 = vld [vmem:[%s2928_s3 + $0x18] sm:$0xff] }
  0xf4   : > { %v413_v39 = vsel %vm368_vm0, %v409_v36, 0.0  ;;  %v363_v41 = vpop.xlane.xlu1 %362 }
  0xf5   : > { %v360_v42 = vpop.xlane.xlu0 %359  ;;  %v373_v43 = vadd.f32 %v372_v40, %v371_v37  ;;  %v374_v44 = vsel %vm368_vm0, %v367_v38, 0.0  ;;  %v411_v45 = vmul.f32 %v363_v41, %v316_v30  ;;  %v414_v48 = vadd.f32 %v413_v39, %v412_v46  ;;  %v323_v46 = vld [vmem:[%s2929_s4 + $0x8] sm:$0xff] }
  0xf6   : > { %v410_v47 = vmul.f32 %v360_v42, %v315_v24  ;;  %v320_v24 = vld [vmem:[%s2928_s3 + $0x10] sm:$0xff]  ;;  %v2112_v40 = vmov 0  }
  0xf7   : > { %v375_v49 = vadd.f32 %v374_v44, %v373_v43  ;;  %v417_v51 = vsel %vm368_vm0, %v411_v45, 0.0  ;;  %1950 = vset.pattern.permute.xlu0 %v2112_v40  ;;  %1951 = vset.pattern.permute.xlu1 %v2112_v40  ;;  %v322_v43 = vld [vmem:[%s2929_s4] sm:$0xff] }
  0xf8   : > { %v415_v50 = vsel %vm368_vm0, %v410_v47, 0.0 }
  0xf9   : > { %v416_v52 = vadd.f32 %v415_v50, %v414_v48  ;;  %v376_v53 = vrot.slane %v375_v49, 4 }
  0xfb   : > { %v377_v54 = vadd.f32 %v376_v53, %v375_v49  ;;  %v418_v55 = vadd.f32 %v417_v51, %v416_v52  ;;  %v324_v49 = vld [vmem:[%s2929_s4 + $0x10] sm:$0xff] }
  0xfd   : > { %v378_v56 = vrot.slane %v377_v54, 2  ;;  %v419_v57 = vrot.slane %v418_v55, 4 }
  0xff   : > { %v379_v58 = vadd.f32 %v378_v56, %v377_v54  ;;  %v420_v59 = vadd.f32 %v419_v57, %v418_v55 }
 0x101   : > { %v380_v60 = vrot.slane %v379_v58, 1  ;;  %v421_v61 = vrot.slane %v420_v59, 2 }
 0x103   : > { %v381_v3 = vadd.f32 %v380_v60, %v379_v58  ;;  %v422_v7 = vadd.f32 %v421_v61, %v420_v59  ;;  %v325_v58 = vld [vmem:[%s2929_s4 + $0x18] sm:$0xff] }
 0x105   : > { %v423_v8 = vrot.slane %v422_v7, 1  ;;  %v382_v12 = vadd.f32 %v381_v3, %v317_v63 }
 0x107   : > { %v424_v13 = vadd.f32 %v423_v8, %v422_v7  ;;  %v383_v16 = vmax.f32 %v382_v12, 0.0 }
 0x109   : > { %v425_v14 = vadd.f32 %v424_v13, %v317_v63  ;;  %v387_v19 = vrot.slane %v383_v16, %v386_v15 }
 0x10b   : > { %v426_v17 = vmax.f32 %v425_v14, 0.0  ;;  %v388_v28 = vmul.f32 %v387_v19, %v318_v21  ;;  %v389_v31 = vmul.f32 %v387_v19, %v319_v20  ;;  %v390_v32 = vmul.f32 %v387_v19, %v320_v24 }
 0x10c   : > { %v391_v37 = vmul.f32 %v387_v19, %v321_v33 }
 0x10d   : > { %v430_v18 = vrot.slane %v426_v17, %v386_v15  ;;  %v392_v30 = vsel %vm368_vm0, %v388_v28, 0.0  ;;  %v395_v34 = vsel %vm368_vm0, %v389_v31, 0.0  ;;  %v398_v35 = vsel %vm368_vm0, %v390_v32, 0.0 }
 0x10e   : > { %v401_v39 = vsel %vm368_vm0, %v391_v37, 0.0 }
 0x10f   : > { %v432_v22 = vmul.f32 %v430_v18, %v319_v20  ;;  %v431_v23 = vmul.f32 %v430_v18, %v318_v21  ;;  %v433_v27 = vmul.f32 %v430_v18, %v320_v24  ;;  %v434_v36 = vmul.f32 %v430_v18, %v321_v33 }
 0x111   : > { %v438_v25 = vsel %vm368_vm0, %v432_v22, 0.0  ;;  %v435_v26 = vsel %vm368_vm0, %v431_v23, 0.0  ;;  %v441_v29 = vsel %vm368_vm0, %v433_v27, 0.0  ;;  %v444_v38 = vsel %vm368_vm0, %v434_v36, 0.0 }
 0x112   : > { %439 = vadd.xlane.f32.xlu1 %v438_v25  ;;  %436 = vadd.xlane.f32.xlu0 %v435_v26 }
 0x116   : > { %442 = vadd.xlane.f32.xlu1 %v441_v29  ;;  %393 = vadd.xlane.f32.xlu0 %v392_v30 }
 0x11a   : > { %396 = vadd.xlane.f32.xlu1 %v395_v34  ;;  %399 = vadd.xlane.f32.xlu0 %v398_v35 }
 0x11e   : > { %445 = vadd.xlane.f32.xlu1 %v444_v38  ;;  %402 = vadd.xlane.f32.xlu0 %v401_v39 }
 0x19f   : > { %v440_v41 = vpop.xlane.xlu1 %439  ;;  %v437_v42 = vpop.xlane.xlu0 %436 }
 0x1a0   : > { %v447_v47 = vadd.f32 %v437_v42, %v322_v43  ;;  %v448_v51 = vadd.f32 %v440_v41, %v323_v46 }
 0x1a3   : > { %v443_v44 = vpop.xlane.xlu1 %442  ;;  %v394_v45 = vpop.xlane.xlu0 %393 }
 0x1a4   : > { %v404_v48 = vadd.f32 %v394_v45, %v322_v43  ;;  %v449_v56 = vadd.f32 %v443_v44, %v324_v49 }
 0x1a6   : > { %v451_v50 = vadd.f32 %v447_v47, %v404_v48 }
 0x1a7   : > { %v397_v52 = vpop.xlane.xlu1 %396  ;;  %v400_v53 = vpop.xlane.xlu0 %399 }
 0x1a8   : > { %v455_v54 = vsub.f32 0.0, %v451_v50  ;;  %v405_v55 = vadd.f32 %v397_v52, %v323_v46  ;;  %v406_v57 = vadd.f32 %v400_v53, %v324_v49 }
 0x1aa   : > { %v459_v59 = vmul.f32 1.442695, %v455_v54  ;;  %v452_v60 = vadd.f32 %v448_v51, %v405_v55  ;;  %v453_v61 = vadd.f32 %v449_v56, %v406_v57 }
 0x1ab   : > { %v446_v62 = vpop.xlane.xlu1 %445  ;;  %v403_v63 = vpop.xlane.xlu0 %402 }
 0x1ac   : > { %1952 = vpow2.f32 %v459_v59  ;;  %v456_v3 = vsub.f32 0.0, %v452_v60  ;;  %v457_v7 = vsub.f32 0.0, %v453_v61  ;;  %v450_v8 = vadd.f32 %v446_v62, %v325_v58 }
 0x1ad   : > { %v407_v12 = vadd.f32 %v403_v63, %v325_v58 }
 0x1ae   : > { %v461_v13 = vmul.f32 1.442695, %v456_v3  ;;  %v463_v14 = vmul.f32 1.442695, %v457_v7 }
 0x1af   : > { %v454_v15 = vadd.f32 %v450_v8, %v407_v12 }
 0x1b0   : > { %1954 = vpow2.f32 %v461_v13 }
 0x1b1   : > { %1956 = vpow2.f32 %v463_v14  ;;  %v458_v16 = vsub.f32 0.0, %v454_v15 }
 0x1b3   : > { %v465_v17 = vmul.f32 1.442695, %v458_v16 }
 0x1b5   : > { %1958 = vpow2.f32 %v465_v17 }
 0x1b6   : > { %v1953_v18 = vpop.eup %1952 }
 0x1b7   : > { %v467_v19 = vadd.f32 1.0, %v1953_v18 }
 0x1b9   : > { %1960 = vrcp.f32 %v467_v19 }
 0x1ba   : > { %v1955_v20 = vpop.eup %1954 }
 0x1bb   : > { %v1957_v21 = vpop.eup %1956  ;;  %v468_v22 = vadd.f32 1.0, %v1955_v20 }
 0x1bc   : > { %v469_v23 = vadd.f32 1.0, %v1957_v21  ;;  %v2145_v21 = vmov 1983009808  }
 0x1bd   : > { %1962 = vrcp.f32 %v468_v22  ;;  %v564_v22 = vunpack.c.l.s4 %v2145_v21  ;;  %v666_v21 = vld [vmem:[#allocation6 + $0x14] sm:$0xf] }
 0x1be   : > { %1964 = vrcp.f32 %v469_v23 }
 0x1bf   : > { %v1959_v24 = vpop.eup %1958 }
 0x1c0   : > { %v470_v25 = vadd.f32 1.0, %v1959_v24 }
 0x1c2   : > { %1966 = vrcp.f32 %v470_v25 }
 0x1c3   : > { %v1961_v26 = vpop.eup %1960 }
 0x1c4   : > { %481 = vperm.xlu0 %1950, %v1961_v26  }
 0x1c7   : > { %v1963_v27 = vpop.eup %1962 }
 0x1c8   : > { %486 = vperm.xlu1 %1951, %v1963_v27   ;;  %v1965_v28 = vpop.eup %1964  ;;  %v565_v27 = vunpack.c.0.s8 %v564_v22 }
 0x1cc   : > { %491 = vperm.xlu1 %1951, %v1965_v28   ;;  %v1967_v29 = vpop.eup %1966 }
 0x1d0   : > { %496 = vperm.xlu1 %1951, %v1967_v29  }
 0x243   : > { %v482_v31 = vpop.permute.xlu0 %481 }
 0x244   : > { %v2457_v35 = vmul.f32 %v482_v31, %v2364_v2  ;;  %v2460_v36 = vmul.f32 %v482_v31, %v2368_v4  ;;  %v2565_v31 = vsub.s32 %v565_v27, %v2415_v9 }
 0x247   : > { %v487_v30 = vpop.permute.xlu1 %486 }
 0x248   : > { %v2451_v32 = vmul.f32 %v487_v30, %v2370_v5  ;;  %v2454_v33 = vmul.f32 %v487_v30, %v2372_v6 }
 0x24a   : > { %v525_v5 = vadd.f32 %v2451_v32, %v2457_v35  ;;  %v534_v6 = vadd.f32 %v2454_v33, %v2460_v36 }
 0x24b   : > { %v492_v34 = vpop.permute.xlu1 %491 }
 0x24c   : > { %v2463_v37 = vmul.f32 %v492_v34, %v2360_v0  ;;  %v2466_v38 = vmul.f32 %v492_v34, %v2362_v1 }
 0x24e   : > { %v526_v40 = vadd.f32 %v525_v5, %v2463_v37  ;;  %v535_v2 = vadd.f32 %v534_v6, %v2466_v38  ;;  %v507_v1 = vmax.f32 %v2457_v35, %v2463_v37  ;;  %v516_v41 = vmax.f32 %v2460_v36, %v2466_v38 }
 0x24f   : > { %v497_v39 = vpop.permute.xlu1 %496 }
 0x250   : > { %v2475_v4 = vmul.f32 %v497_v39, %v2380_v10  ;;  %v2478_v0 = vmul.f32 %v497_v39, %v2382_v11 }
 0x252   : > { %v508_v42 = vmax.f32 %v2451_v32, %v2475_v4  ;;  %v517_v43 = vmax.f32 %v2454_v33, %v2478_v0  ;;  %v527_v44 = vadd.f32 %v526_v40, %v2475_v4  ;;  %v536_v10 = vadd.f32 %v535_v2, %v2478_v0 }
 0x254   : > { %v509_v45 = vmax.f32 %v507_v1, %v508_v42  ;;  %v518_v46 = vmax.f32 %v516_v41, %v517_v43  ;;  %v528_v11 = vrot.slane %v527_v44, 4  ;;  %v537_v47 = vrot.slane %v536_v10, 4  ;;  %v549_v1 = vld [vmem:[#allocation6] sm:$0xf]  ;;  %v574_v41 = vld [vmem:[#allocation6 + $0x4] sm:$0xf] }
 0x256   : > { %v510_v48 = vrot.slane %v509_v45, 4  ;;  %v519_v49 = vrot.slane %v518_v46, 4  ;;  %v529_v50 = vadd.f32 %v528_v11, %v527_v44  ;;  %v538_v51 = vadd.f32 %v537_v47, %v536_v10  ;;  %v597_v47 = vld [vmem:[#allocation6 + $0x8] sm:$0xf] }
 0x258   : > { %v511_v52 = vmax.f32 %v509_v45, %v510_v48  ;;  %v520_v53 = vmax.f32 %v518_v46, %v519_v49  ;;  %v530_v54 = vrot.slane %v529_v50, 2  ;;  %v539_v55 = vrot.slane %v538_v51, 2 }
 0x25a   : > { %v512_v56 = vrot.slane %v511_v52, 2  ;;  %v521_v57 = vrot.slane %v520_v53, 2  ;;  %v531_v58 = vadd.f32 %v530_v54, %v529_v50  ;;  %v540_v59 = vadd.f32 %v539_v55, %v538_v51 }
 0x25c   : > { %v513_v60 = vmax.f32 %v511_v52, %v512_v56  ;;  %v522_v61 = vmax.f32 %v520_v53, %v521_v57  ;;  %v532_v62 = vrot.slane %v531_v58, 1  ;;  %v541_v63 = vrot.slane %v540_v59, 1  ;;  %v620_v56 = vld [vmem:[#allocation6 + $0xc] sm:$0xf] }
 0x25e   : > { %v514_v3 = vrot.slane %v513_v60, 1  ;;  %v523_v7 = vrot.slane %v522_v61, 1  ;;  %v533_v8 = vadd.f32 %v532_v62, %v531_v58  ;;  %v542_v12 = vadd.f32 %v541_v63, %v540_v59 }
 0x260   : > { %v515_v13 = vmax.f32 %v513_v60, %v514_v3  ;;  %v524_v14 = vmax.f32 %v522_v61, %v523_v7  ;;  %v544_v15 = vmul.f32 0.03125, %v533_v8  ;;  %v545_v16 = vmul.f32 0.03125, %v542_v12  ;;  %v643_v7 = vld [vmem:[#allocation6 + $0x10] sm:$0xf] }
 0x262   : > { %v2490_v17 = vsel %vm546_vm1, %v515_v13, %v544_v15  ;;  %v2492_v18 = vsel %vm546_vm1, %v524_v14, %v545_v16  ;;  %vm879_vm1 = vcmask 154624  }
 0x263   : > { %551 = vrot.lane.b32.xlu1 %v2492_v18, %s2113_s8  ;;  %601 = vrot.lane.b32.xlu0 %v2490_v17, %s2114_s10 }
 0x267   : > { %624 = vrot.lane.b32.xlu0 %v2490_v17, %s2115_s24  ;;  %555 = vrot.lane.b32.xlu1 %v2490_v17, %s2113_s8  ;;  %s2126_s8 = smov 29  }
 0x26b   : > { %647 = vrot.lane.b32.xlu0 %v2490_v17, %s2116_s15  ;;  %575 = vrot.lane.b32.xlu1 %v2492_v18, %s2117_s16 }
 0x26f   : > { %670 = vrot.lane.b32.xlu0 %v2490_v17, %s2118_s25  ;;  %578 = vrot.lane.b32.xlu1 %v2490_v17, %s2117_s16  ;;  %s2130_s16 = smov 16  }
 0x273   : > { %693 = vrot.lane.b32.xlu0 %v2490_v17, %s2119_s23  ;;  %598 = vrot.lane.b32.xlu1 %v2492_v18, %s2114_s10  ;;  %s2127_s10 = smov 19  }
 0x277   : > { %716 = vrot.lane.b32.xlu0 %v2490_v17, %s2120_s12  ;;  %621 = vrot.lane.b32.xlu1 %v2492_v18, %s2115_s24  ;;  %s2128_s24 = smov 18  }
 0x27b   : > { %739 = vrot.lane.b32.xlu0 %v2490_v17, %s2121_s11  ;;  %644 = vrot.lane.b32.xlu1 %v2492_v18, %s2116_s15  ;;  %s2129_s15 = smov 17  }
 0x27f   : > { %762 = vrot.lane.b32.xlu0 %v2490_v17, %s2122_s30  ;;  %667 = vrot.lane.b32.xlu1 %v2492_v18, %s2118_s25  ;;  %s2131_s25 = smov 15  }
 0x283   : > { %785 = vrot.lane.b32.xlu0 %v2490_v17, %s2123_s17  ;;  %690 = vrot.lane.b32.xlu1 %v2492_v18, %s2119_s23  ;;  %s2132_s23 = smov 14  }
 0x287   : > { %808 = vrot.lane.b32.xlu0 %v2490_v17, %s2124_s13  ;;  %713 = vrot.lane.b32.xlu1 %v2492_v18, %s2120_s12  ;;  %s2133_s12 = smov 13  }
 0x28b   : > { %831 = vrot.lane.b32.xlu0 %v2490_v17, %s2125_s20  ;;  %736 = vrot.lane.b32.xlu1 %v2492_v18, %s2121_s11  ;;  %s2134_s11 = smov 3  }
 0x28f   : > { %854 = vrot.lane.b32.xlu0 %v2490_v17, %s2126_s8  ;;  %759 = vrot.lane.b32.xlu1 %v2492_v18, %s2122_s30  ;;  %s2135_s30 = smov 2  }
 0x293   : > { %877 = vrot.lane.b32.xlu0 %v2490_v17, %s2127_s10  ;;  %782 = vrot.lane.b32.xlu1 %v2492_v18, %s2123_s17  ;;  %s2136_s17 = smov 1  }
 0x297   : > { %900 = vrot.lane.b32.xlu0 %v2490_v17, %s2128_s24  ;;  %805 = vrot.lane.b32.xlu1 %v2492_v18, %s2124_s13  ;;  %s2137_s13 = smov 127  }
 0x29b   : > { %923 = vrot.lane.b32.xlu0 %v2490_v17, %s2129_s15  ;;  %828 = vrot.lane.b32.xlu1 %v2492_v18, %s2125_s20  ;;  %s2138_s20 = smov 126  }
 0x29f   : > { %946 = vrot.lane.b32.xlu0 %v2490_v17, %s2130_s16  ;;  %851 = vrot.lane.b32.xlu1 %v2492_v18, %s2126_s8  ;;  %s2139_s8 = smov 125  }
 0x2a3   : > { %969 = vrot.lane.b32.xlu0 %v2490_v17, %s2131_s25  ;;  %874 = vrot.lane.b32.xlu1 %v2492_v18, %s2127_s10  ;;  %s2140_s10 = smov 115  }
 0x2a7   : > { %992 = vrot.lane.b32.xlu0 %v2490_v17, %s2132_s23  ;;  %897 = vrot.lane.b32.xlu1 %v2492_v18, %s2128_s24  ;;  %s2141_s24 = smov 114  }
 0x2ab   : > { %1015 = vrot.lane.b32.xlu0 %v2490_v17, %s2133_s12  ;;  %920 = vrot.lane.b32.xlu1 %v2492_v18, %s2129_s15  ;;  %s2142_s15 = smov 113  }
 0x2af   : > { %1038 = vrot.lane.b32.xlu0 %v2490_v17, %s2134_s11  ;;  %943 = vrot.lane.b32.xlu1 %v2492_v18, %s2130_s16 }
 0x2b3   : > { %1061 = vrot.lane.b32.xlu0 %v2490_v17, %s2135_s30  ;;  %966 = vrot.lane.b32.xlu1 %v2492_v18, %s2131_s25  ;;  %s2143_s25 = smov 112  }
 0x2b7   : > { %1083 = vrot.lane.b32.xlu0 %v2490_v17, %s2136_s17  ;;  %989 = vrot.lane.b32.xlu1 %v2492_v18, %s2132_s23  ;;  %s2144_s23 = smov 111  }
 0x2bb   : > { %1118 = vrot.lane.b32.xlu0 %v2492_v18, %s2137_s13  ;;  %1012 = vrot.lane.b32.xlu1 %v2492_v18, %s2133_s12  ;;  %s2146_s12 = smov 110  }
 0x2bf   : > { %1141 = vrot.lane.b32.xlu0 %v2492_v18, %s2138_s20  ;;  %1035 = vrot.lane.b32.xlu1 %v2492_v18, %s2134_s11  ;;  %s2147_s11 = smov 109  }
 0x2c3   : > { %1164 = vrot.lane.b32.xlu0 %v2492_v18, %s2139_s8  ;;  %1058 = vrot.lane.b32.xlu1 %v2492_v18, %s2135_s30  ;;  %s2148_s30 = smov 99  }
 0x2c7   : > { %1187 = vrot.lane.b32.xlu0 %v2492_v18, %s2140_s10  ;;  %1080 = vrot.lane.b32.xlu1 %v2492_v18, %s2136_s17  ;;  %s2149_s17 = smov 98  }
 0x2cb   : > { %1210 = vrot.lane.b32.xlu0 %v2492_v18, %s2141_s24  ;;  %1116 = vrot.lane.b32.xlu1 %v2490_v17, %s2137_s13  ;;  %s2150_s13 = smov 97  }
 0x2cf   : > { %1233 = vrot.lane.b32.xlu0 %v2492_v18, %s2142_s15  ;;  %1139 = vrot.lane.b32.xlu1 %v2490_v17, %s2138_s20  ;;  %s2151_s20 = smov 96  }
 0x2d3   : > { %1256 = vrot.lane.b32.xlu0 %v2492_v18, %s2143_s25  ;;  %1162 = vrot.lane.b32.xlu1 %v2490_v17, %s2139_s8  ;;  %s2152_s8 = smov 95  }
 0x2d5   : > { %v552_v19 = vpop.permute.xlu1 %551  ;;  %v602_v20 = vpop.permute.xlu0 %601 }
 0x2d7   : > { %1279 = vrot.lane.b32.xlu0 %v2492_v18, %s2144_s23  ;;  %1185 = vrot.lane.b32.xlu1 %v2490_v17, %s2140_s10  ;;  %s2153_s10 = smov 94  }
 0x2d9   : > { %v625_v23 = vpop.permute.xlu0 %624  ;;  %v556_v24 = vpop.permute.xlu1 %555 }
 0x2da   : > { %v558_v25 = vsel %vm557_vm2, %v556_v24, %v552_v19  ;;  %v560_v26 = vsel %vm557_vm2, %v552_v19, %v556_v24  ;;  %vm902_vm2 = vcmask 146432  }
 0x2db   : > { %1302 = vrot.lane.b32.xlu0 %v2492_v18, %s2146_s12  ;;  %1208 = vrot.lane.b32.xlu1 %v2490_v17, %s2141_s24  ;;  %v562_v30 = vcombine.low %v560_v26, %v558_v25  ;;  %s2154_s24 = smov 93  }
 0x2dd   : > { %v648_v28 = vpop.permute.xlu0 %647  ;;  %v576_v29 = vpop.permute.xlu1 %575  ;;  %v569_v40 = vrot.slane %v562_v30, %v2565_v31  ;;  %v689_v30 = vld [vmem:[#allocation6 + $0x18] sm:$0xf] }
 0x2df   : > { %1325 = vrot.lane.b32.xlu0 %v2492_v18, %s2147_s11  ;;  %1231 = vrot.lane.b32.xlu1 %v2490_v17, %s2142_s15  ;;  %v571_v45 = vmul.f32 %v569_v40, %v549_v1  ;;  %s2155_s15 = smov 83  }
 0x2e1   : > { %v671_v34 = vpop.permute.xlu0 %670  ;;  %v579_v5 = vpop.permute.xlu1 %578 }
 0x2e2   : > { %v581_v6 = vsel %vm580_vm3, %v579_v5, %v576_v29  ;;  %v583_v39 = vsel %vm580_vm3, %v576_v29, %v579_v5  ;;  %vm925_vm3 = vcmask 138240  }
 0x2e3   : > { %v585_v2 = vcombine.low %v583_v39, %v581_v6  ;;  %1348 = vrot.lane.b32.xlu0 %v2492_v18, %s2148_s30  ;;  %1254 = vrot.lane.b32.xlu1 %v2490_v17, %s2143_s25  ;;  %s2156_s25 = smov 82  }
 0x2e5   : > { %v592_v9 = vrot.slane %v585_v2, %v2565_v31  ;;  %v694_v42 = vpop.permute.xlu0 %693  ;;  %v599_v43 = vpop.permute.xlu1 %598 }
 0x2e6   : > { %v604_v44 = vsel %vm603_vm4, %v602_v20, %v599_v43  ;;  %v606_v10 = vsel %vm603_vm4, %v599_v43, %v602_v20  ;;  %vm948_vm4 = vcmask 130048  }
 0x2e7   : > { %v594_v46 = vmul.f32 %v592_v9, %v574_v41  ;;  %v608_v11 = vcombine.low %v606_v10, %v604_v44  ;;  %1371 = vrot.lane.b32.xlu0 %v2492_v18, %s2149_s17  ;;  %1277 = vrot.lane.b32.xlu1 %v2490_v17, %s2144_s23  ;;  %v712_v9 = vld [vmem:[#allocation6 + $0x1c] sm:$0xf]  ;;  %s2157_s23 = smov 81  }
 0x2e9   : > { %v595_v48 = vadd.f32 %v594_v46, %v571_v45  ;;  %v615_v49 = vrot.slane %v608_v11, %v2565_v31  ;;  %v717_v50 = vpop.permute.xlu0 %716  ;;  %v622_v51 = vpop.permute.xlu1 %621 }
 0x2ea   : > { %v627_v52 = vsel %vm626_vm5, %v625_v23, %v622_v51  ;;  %v629_v53 = vsel %vm626_vm5, %v622_v51, %v625_v23  ;;  %vm971_vm5 = vcmask 121856  }
 0x2eb   : > { %v617_v54 = vmul.f32 %v615_v49, %v597_v47  ;;  %v631_v55 = vcombine.low %v629_v53, %v627_v52  ;;  %1394 = vrot.lane.b32.xlu0 %v2492_v18, %s2150_s13  ;;  %1300 = vrot.lane.b32.xlu1 %v2490_v17, %s2146_s12  ;;  %s2158_s12 = smov 80  }
 0x2ed   : > { %v618_v57 = vadd.f32 %v617_v54, %v595_v48  ;;  %v638_v58 = vrot.slane %v631_v55, %v2565_v31  ;;  %v740_v59 = vpop.permute.xlu0 %739  ;;  %v645_v60 = vpop.permute.xlu1 %644  ;;  %v735_v48 = vld [vmem:[#allocation6 + $0x20] sm:$0xf] }
 0x2ee   : > { %v650_v61 = vsel %vm649_vm6, %v648_v28, %v645_v60  ;;  %v652_v62 = vsel %vm649_vm6, %v645_v60, %v648_v28  ;;  %vm994_vm6 = vcmask 113664  }
 0x2ef   : > { %v640_v63 = vmul.f32 %v638_v58, %v620_v56  ;;  %v654_v3 = vcombine.low %v652_v62, %v650_v61  ;;  %1417 = vrot.lane.b32.xlu0 %v2492_v18, %s2151_s20  ;;  %1323 = vrot.lane.b32.xlu1 %v2490_v17, %s2147_s11  ;;  %s2159_s11 = smov 79  }
 0x2f1   : > { %v641_v8 = vadd.f32 %v640_v63, %v618_v57  ;;  %v661_v12 = vrot.slane %v654_v3, %v2565_v31  ;;  %v763_v13 = vpop.permute.xlu0 %762  ;;  %v668_v14 = vpop.permute.xlu1 %667  ;;  %v758_v57 = vld [vmem:[#allocation6 + $0x24] sm:$0xf] }
 0x2f2   : > { %v673_v15 = vsel %vm672_vm7, %v671_v34, %v668_v14  ;;  %v675_v16 = vsel %vm672_vm7, %v668_v14, %v671_v34  ;;  %vm1017_vm7 = vcmask 105472  }
 0x2f3   : > { %v663_v19 = vmul.f32 %v661_v12, %v643_v7  ;;  %v677_v20 = vcombine.low %v675_v16, %v673_v15  ;;  %1440 = vrot.lane.b32.xlu0 %v2492_v18, %s2152_s8  ;;  %1346 = vrot.lane.b32.xlu1 %v2490_v17, %s2148_s30  ;;  %s2160_s30 = smov 78  }
 0x2f5   : > { %v664_v22 = vadd.f32 %v663_v19, %v641_v8  ;;  %v684_v23 = vrot.slane %v677_v20, %v2565_v31  ;;  %v786_v24 = vpop.permute.xlu0 %785  ;;  %v691_v25 = vpop.permute.xlu1 %690  ;;  %v781_v8 = vld [vmem:[#allocation6 + $0x28] sm:$0xf] }
 0x2f6   : > { %v696_v26 = vsel %vm695_vm8, %v694_v42, %v691_v25  ;;  %v698_v27 = vsel %vm695_vm8, %v691_v25, %v694_v42  ;;  %vm1040_vm8 = vcmask 23552  }
 0x2f7   : > { %v686_v28 = vmul.f32 %v684_v23, %v666_v21  ;;  %v700_v29 = vcombine.low %v698_v27, %v696_v26  ;;  %1463 = vrot.lane.b32.xlu0 %v2492_v18, %s2153_s10  ;;  %1369 = vrot.lane.b32.xlu1 %v2490_v17, %s2149_s17  ;;  %s2161_s17 = smov 77  }
 0x2f9   : > { %v687_v34 = vadd.f32 %v686_v28, %v664_v22  ;;  %v707_v5 = vrot.slane %v700_v29, %v2565_v31  ;;  %v809_v6 = vpop.permute.xlu0 %808  ;;  %v714_v39 = vpop.permute.xlu1 %713  ;;  %v804_v22 = vld [vmem:[#allocation6 + $0x2c] sm:$0xf] }
 0x2fa   : > { %v719_v40 = vsel %vm718_vm9, %v717_v50, %v714_v39  ;;  %v721_v2 = vsel %vm718_vm9, %v714_v39, %v717_v50  ;;  %vm1085_vm9 = vcmask 7168  }
 0x2fb   : > { %v709_v1 = vmul.f32 %v707_v5, %v689_v30  ;;  %v723_v41 = vcombine.low %v721_v2, %v719_v40  ;;  %1486 = vrot.lane.b32.xlu0 %v2492_v18, %s2154_s24  ;;  %1392 = vrot.lane.b32.xlu1 %v2490_v17, %s2150_s13  ;;  %s326_s13 = sld [smem:[#allocation2]] }
 0x2fd   : > { %v710_v42 = vadd.f32 %v709_v1, %v687_v34  ;;  %v730_v43 = vrot.slane %v723_v41, %v2565_v31  ;;  %v832_v44 = vpop.permute.xlu0 %831  ;;  %v737_v10 = vpop.permute.xlu1 %736  ;;  %v827_v34 = vld [vmem:[#allocation6 + $0x30] sm:$0xf] }
 0x2fe   : > { %v742_v45 = vsel %vm741_vm10, %v740_v59, %v737_v10  ;;  %v744_v46 = vsel %vm741_vm10, %v737_v10, %v740_v59  ;;  %vm1143_vm10 = vcmask 1031168  }
 0x2ff   : > { %v732_v11 = vmul.f32 %v730_v43, %v712_v9  ;;  %v746_v47 = vcombine.low %v744_v46, %v742_v45  ;;  %1509 = vrot.lane.b32.xlu0 %v2492_v18, %s2155_s15  ;;  %1415 = vrot.lane.b32.xlu1 %v2490_v17, %s2151_s20  ;;  %s1837_s20 = sshll.u32 %s2228_s6, 10  ;;  %s1724_s6 = scalar_lea.sflag [#allocation5], %s2346_s21 }
 0x301   : > { %v733_v49 = vadd.f32 %v732_v11, %v710_v42  ;;  %v753_v50 = vrot.slane %v746_v47, %v2565_v31  ;;  %v855_v51 = vpop.permute.xlu0 %854  ;;  %v760_v52 = vpop.permute.xlu1 %759  ;;  %v850_v42 = vld [vmem:[#allocation6 + $0x34] sm:$0xf] }
 0x302   : > { %v765_v53 = vsel %vm764_vm11, %v763_v13, %v760_v52  ;;  %v767_v54 = vsel %vm764_vm11, %v760_v52, %v763_v13  ;;  %vm1166_vm11 = vcmask 1022976  }
 0x303   : > { %v755_v55 = vmul.f32 %v753_v50, %v735_v48  ;;  %v769_v56 = vcombine.low %v767_v54, %v765_v53  ;;  %1532 = vrot.lane.b32.xlu0 %v2492_v18, %s2156_s25  ;;  %1438 = vrot.lane.b32.xlu1 %v2490_v17, %s2152_s8  ;;  %s312_s8 = scalar_lea.vmem [#allocation8], %s1828_s22 }
 0x305   : > { %v756_v58 = vadd.f32 %v755_v55, %v733_v49  ;;  %v776_v59 = vrot.slane %v769_v56, %v2565_v31  ;;  %v878_v60 = vpop.permute.xlu0 %877  ;;  %v783_v61 = vpop.permute.xlu1 %782  ;;  %v873_v49 = vld [vmem:[#allocation6 + $0x38] sm:$0xf] }
 0x306   : > { %v788_v62 = vsel %vm787_vm12, %v786_v24, %v783_v61  ;;  %v790_v63 = vsel %vm787_vm12, %v783_v61, %v786_v24  ;;  %vm1189_vm12 = vcmask 941056  }
 0x307   : > { %v778_v3 = vmul.f32 %v776_v59, %v758_v57  ;;  %v792_v7 = vcombine.low %v790_v63, %v788_v62  ;;  %1555 = vrot.lane.b32.xlu0 %v2492_v18, %s2157_s23  ;;  %1461 = vrot.lane.b32.xlu1 %v2490_v17, %s2153_s10  ;;  %s1737_s10 = sshll.u32 %s312_s8, 4  ;;  %s2880_s10 = int_to_ptr.vmem [resolvable:$true] %s1737_s10 }
 0x308   : > { %s2034_s22 = scalar_lea.vmem %s2880_s10, 1024 }
 0x309   : > { %v779_v12 = vadd.f32 %v778_v3, %v756_v58  ;;  %v799_v13 = vrot.slane %v792_v7, %v2565_v31  ;;  %v2618_v14 = vpop.permute.xlu0 %900  ;;  %v806_v15 = vpop.permute.xlu1 %805  ;;  %p2035_p4 = scmp.ne.s32.totalorder %s2880_s10, %s2034_s22 }
 0x30a   : > { %v811_v16 = vsel %vm810_vm13, %v809_v6, %v806_v15  ;;  %v813_v19 = vsel %vm810_vm13, %v806_v15, %v809_v6  ;;  %vm1212_vm13 = vcmask 932864  }
 0x30b   : > { %v801_v20 = vmul.f32 %v799_v13, %v781_v8  ;;  %v815_v21 = vcombine.low %v813_v19, %v811_v16  ;;  %1578 = vrot.lane.b32.xlu0 %v2492_v18, %s2158_s12  ;;  %1484 = vrot.lane.b32.xlu1 %v2490_v17, %s2154_s24  ;;  %p2036_p6 = pnand %p2035_p4, %p2298_p12 }
 0x30d   : > { %v802_v23 = vadd.f32 %v801_v20, %v779_v12  ;;  %v822_v24 = vrot.slane %v815_v21, %v2565_v31  ;;  %v2625_v25 = vpop.permute.xlu0 %923  ;;  %v829_v26 = vpop.permute.xlu1 %828  ;;  %p2037_p8 = pneg %p2036_p6 }
 0x30e   : > { %v834_v27 = vsel %vm833_vm14, %v832_v44, %v829_v26  ;;  %v836_v28 = vsel %vm833_vm14, %v829_v26, %v832_v44  ;;  %vm1235_vm14 = vcmask 924672  }
 0x30f   : > { %v824_v29 = vmul.f32 %v822_v24, %v804_v22  ;;  %v838_v30 = vcombine.low %v836_v28, %v834_v27  ;;  %1601 = vrot.lane.b32.xlu0 %v2492_v18, %s2159_s11  ;;  %1507 = vrot.lane.b32.xlu1 %v2490_v17, %s2155_s15 }
 0x311   : > { %v825_v5 = vadd.f32 %v824_v29, %v802_v23  ;;  %v845_v6 = vrot.slane %v838_v30, %v2565_v31  ;;  %v2632_v39 = vpop.permute.xlu0 %946  ;;  %v852_v40 = vpop.permute.xlu1 %851 }
 0x312   : > { %v857_v2 = vsel %vm856_vm15, %v855_v51, %v852_v40  ;;  %v859_v1 = vsel %vm856_vm15, %v852_v40, %v855_v51  ;;  %vm1258_vm15 = vcmask 916480  }
 0x313   : > { %v847_v41 = vmul.f32 %v845_v6, %v827_v34  ;;  %v861_v9 = vcombine.low %v859_v1, %v857_v2  ;;  %1624 = vrot.lane.b32.xlu0 %v2492_v18, %s2160_s30  ;;  %1530 = vrot.lane.b32.xlu1 %v2490_v17, %s2156_s25  ;;  %s2874_s25 = scalar_lea.hbm %s2932_s7, %s1837_s20 }
 0x315   : > { %v848_v43 = vadd.f32 %v847_v41, %v825_v5  ;;  %v868_v44 = vrot.slane %v861_v9, %v2565_v31  ;;  %v2638_v10 = vpop.permute.xlu0 %969  ;;  %v875_v45 = vpop.permute.xlu1 %874 }
 0x316   : > { %v880_v46 = vsel %vm879_vm1, %v878_v60, %v875_v45  ;;  %v882_v11 = vsel %vm879_vm1, %v875_v45, %v878_v60  ;;  %vm1281_vm1 = vcmask 908288  }
 0x317   : > { %v870_v47 = vmul.f32 %v868_v44, %v850_v42  ;;  %v884_v48 = vcombine.low %v882_v11, %v880_v46  ;;  %1647 = vrot.lane.b32.xlu0 %v2492_v18, %s2161_s17  ;;  %1553 = vrot.lane.b32.xlu1 %v2490_v17, %s2157_s23  ;;  %s2162_s23 = smov [#allocation8]  }
 0x319   : > { %v871_v50 = vadd.f32 %v870_v47, %v848_v43  ;;  %v891_v51 = vrot.slane %v884_v48, %v2565_v31  ;;  %v993_v52 = vpop.permute.xlu0 %992  ;;  %v898_v53 = vpop.permute.xlu1 %897 }
 0x31a   : > { %v903_v29 = vsel %vm902_vm2, %v2618_v14, %v898_v53  ;;  %v905_v30 = vsel %vm902_vm2, %v898_v53, %v2618_v14  ;;  %vm1304_vm2 = vcmask 900096  }
 0x31b   : > { %v893_v54 = vmul.f32 %v891_v51, %v873_v49  ;;  %1576 = vrot.lane.b32.xlu1 %v2490_v17, %s2158_s12  ;;  %v907_v2 = vcombine.low %v905_v30, %v903_v29  ;;  %v919_v51 = vld [vmem:[#allocation6 + $0x40] sm:$0xf]  ;;  %s2038_s12 = sshll.u32 %s2162_s23, 4  ;;  %s2039_s12 = int_to_ptr.vmem [resolvable:$false] %s2038_s12 }
 0x31c   : > { %p2041_p10 = scmp.lt.s32.totalorder %s2880_s10, %s2039_s12 }
 0x31d   : > { %v2646_v55 = vadd.f32 %v893_v54, %v871_v50  ;;  %v1016_v56 = vpop.permute.xlu0 %1015  ;;  %v921_v57 = vpop.permute.xlu1 %920  ;;  %v914_v45 = vrot.slane %v907_v2, %v2565_v31 }
 0x31e   : > { %v926_v6 = vsel %vm925_vm3, %v2625_v25, %v921_v57  ;;  %v928_v40 = vsel %vm925_vm3, %v921_v57, %v2625_v25  ;;  %v896_v25 = vld [vmem:[#allocation6 + $0x3c] sm:$0xf]  ;;  %vm1327_vm3 = vcmask 891904  }
 0x31f   : > { %1599 = vrot.lane.b32.xlu1 %v2490_v17, %s2159_s11  ;;  %v930_v9 = vcombine.low %v928_v40, %v926_v6  ;;  %v916_v57 = vmul.f32 %v914_v45, %v896_v25  ;;  %s2040_s11 = scalar_lea.vmem %s2039_s12, 2048 }
 0x320   : > { %p2042_p13 = scmp.lt.s32.totalorder %s2040_s11, %s2034_s22 }
 0x321   : > { %v2650_v58 = vpop.permute.xlu0 %1038  ;;  %v944_v59 = vpop.permute.xlu1 %943  ;;  %v937_v48 = vrot.slane %v930_v9, %v2565_v31 }
 0x322   : > { %v949_v1 = vsel %vm948_vm4, %v2632_v39, %v944_v59  ;;  %v951_v41 = vsel %vm948_vm4, %v944_v59, %v2632_v39  ;;  %vm1350_vm4 = vcmask 809984   ;;  %p2043_p3 = por %p2042_p13, %p2041_p10 }
 0x323   : > { %1622 = vrot.lane.b32.xlu1 %v2490_v17, %s2160_s30  ;;  %v953_v46 = vcombine.low %v951_v41, %v949_v1  ;;  %v965_v1 = vld [vmem:[#allocation6 + $0x48] sm:$0xf]  ;;  %v917_v41 = vadd.f32 %v916_v57, %v2646_v55  ;;  %v1011_v55 = vld [vmem:[#allocation6 + $0x50] sm:$0xf] }
 0x324   : > { %p2044_p7 = pnand %p2043_p3, %p2037_p8 }
 0x325   : > { %v2653_v60 = vpop.permute.xlu0 %1061  ;;  %v967_v61 = vpop.permute.xlu1 %966 }
 0x326   : > { %v972_v43 = vsel %vm971_vm5, %v2638_v10, %v967_v61  ;;  %v974_v44 = vsel %vm971_vm5, %v967_v61, %v2638_v10  ;;  %v960_v10 = vrot.slane %v953_v46, %v2565_v31  ;;  %v942_v61 = vld [vmem:[#allocation6 + $0x44] sm:$0xf]  ;;  %vm1373_vm5 = vcmask 801792  }
 0x327   : > { %1645 = vrot.lane.b32.xlu1 %v2490_v17, %s2161_s17  ;;  %v976_v39 = vcombine.low %v974_v44, %v972_v43  ;;  %v988_v43 = vld [vmem:[#allocation6 + $0x4c] sm:$0xf] }
 0x328   : > { %v962_v9 = vmul.f32 %v960_v10, %v942_v61  ;;  %v1057_v61 = vld [vmem:[#allocation6 + $0x58] sm:$0xf] }
 0x329   : > { %v2656_v62 = vpop.permute.xlu0 %1083  ;;  %v990_v63 = vpop.permute.xlu1 %989  ;;  %v983_v30 = vrot.slane %v976_v39, %v2565_v31 }
 0x32a   : > { %v995_v11 = vsel %vm994_vm6, %v993_v52, %v990_v63  ;;  %v997_v47 = vsel %vm994_vm6, %v990_v63, %v993_v52  ;;  %v939_v63 = vmul.f32 %v937_v48, %v919_v51  ;;  %vm1396_vm6 = vcmask 793600  }
 0x32b   : > { %v999_v59 = vcombine.low %v997_v47, %v995_v11  ;;  %v985_v25 = vmul.f32 %v983_v30, %v965_v1  ;;  %v1079_v30 = vld [vmem:[#allocation6 + $0x5c] sm:$0xf] }
 0x32c   : > { %v940_v46 = vadd.f32 %v939_v63, %v917_v41  ;;  %v1103_v41 = vcombine.low %v2490_v17, %v2492_v18 }
 0x32d   : > { %v2658_v3 = vpop.permute.xlu0 %1118  ;;  %v1013_v7 = vpop.permute.xlu1 %1012 }
 0x32e   : > { %v1018_v53 = vsel %vm1017_vm7, %v1016_v56, %v1013_v7  ;;  %v1020_v54 = vsel %vm1017_vm7, %v1013_v7, %v1016_v56  ;;  %vm1419_vm7 = vcmask 785408  }
 0x32f   : > { %v1022_v6 = vcombine.low %v1020_v54, %v1018_v53  ;;  %v1034_v54 = vld [vmem:[#allocation6 + $0x54] sm:$0xf] }
 0x331   : > { %v2660_v8 = vpop.permute.xlu0 %1141  ;;  %v1036_v12 = vpop.permute.xlu1 %1035  ;;  %v1029_v11 = vrot.slane %v1022_v6, %v2565_v31 }
 0x332   : > { %v1041_v29 = vsel %vm1040_vm8, %v2650_v58, %v1036_v12  ;;  %v1043_v52 = vsel %vm1040_vm8, %v1036_v12, %v2650_v58  ;;  %v1006_v58 = vrot.slane %v999_v59, %v2565_v31  ;;  %vm1442_vm8 = vcmask 777216  }
 0x333   : > { %v1045_v12 = vcombine.low %v1043_v52, %v1041_v29  ;;  %v1031_v10 = vmul.f32 %v1029_v11, %v1011_v55 }
 0x334   : > { %v1008_v39 = vmul.f32 %v1006_v58, %v988_v43 }
 0x335   : > { %v2662_v13 = vpop.permute.xlu0 %1164  ;;  %v1059_v15 = vpop.permute.xlu1 %1058  ;;  %v1052_v51 = vrot.slane %v1045_v12, %v2565_v31 }
 0x336   : > { %v1063_v56 = vsel %vm368_vm0, %v2653_v60, %v1059_v15  ;;  %v1065_v7 = vsel %vm368_vm0, %v1059_v15, %v2653_v60  ;;  %v963_v15 = vadd.f32 %v962_v9, %v940_v46  ;;  %vm1120_vm0 = vcmask 1039360  }
 0x337   : > { %v1067_v47 = vcombine.low %v1065_v7, %v1063_v56  ;;  %v1054_v52 = vmul.f32 %v1052_v51, %v1034_v54 }
 0x338   : > { %v986_v57 = vadd.f32 %v985_v25, %v963_v15 }
 0x339   : > { %v2664_v16 = vpop.permute.xlu0 %1187  ;;  %v2666_v19 = vpop.permute.xlu1 %1080 }
 0x33a   : > { %v1086_v44 = vsel %vm1085_vm9, %v2656_v62, %v2666_v19  ;;  %v1088_v45 = vsel %vm1085_vm9, %v2666_v19, %v2656_v62  ;;  %v1074_v62 = vrot.slane %v1067_v47, %v2565_v31  ;;  %v1009_v29 = vadd.f32 %v1008_v39, %v986_v57 }
 0x33b   : > { %v1090_v53 = vcombine.low %v1088_v45, %v1086_v44  ;;  %vm1465_vm9 = vcmask 769024  }
 0x33c   : > { %v1032_v56 = vadd.f32 %v1031_v10, %v1009_v29  ;;  %v1076_v7 = vmul.f32 %v1074_v62, %v1057_v61 }
 0x33d   : > { %v2668_v20 = vpop.permute.xlu0 %1210  ;;  %v2670_v21 = vpop.permute.xlu1 %1116  ;;  %v1097_v63 = vrot.slane %v1090_v53, %v2565_v31 }
 0x33e   : > { %v1121_v6 = vsel %vm1120_vm0, %v2670_v21, %v2658_v3  ;;  %v1124_v1 = vsel %vm1120_vm0, %v2658_v3, %v2670_v21  ;;  %v1055_v44 = vadd.f32 %v1054_v52, %v1032_v56  ;;  %v1110_v21 = vrot.slane %v1103_v41, %v2565_v31 }
 0x33f   : > { %v1099_v45 = vmul.f32 %v1097_v63, %v1079_v30  ;;  %v1126_v46 = vcombine.low %v1121_v6, %v1124_v1  ;;  %v1161_v30 = vld [vmem:[#allocation6 + $0x6c] sm:$0xf]  ;;  %vm1488_vm0 = vcmask 760832  }
 0x340   : > { %v1077_v18 = vadd.f32 %v1076_v7, %v1055_v44 }
 0x341   : > { %v2672_v22 = vpop.permute.xlu0 %1233  ;;  %v2674_v23 = vpop.permute.xlu1 %1139  ;;  %v1133_v39 = vrot.slane %v1126_v46, %v2565_v31  ;;  %v1207_v46 = vld [vmem:[#allocation6 + $0x74] sm:$0xf] }
 0x342   : > { %v1144_v12 = vsel %vm1143_vm10, %v2674_v23, %v2660_v8  ;;  %v1147_v43 = vsel %vm1143_vm10, %v2660_v8, %v2674_v23  ;;  %v1102_v8 = vld [vmem:[#allocation6 + $0x60] sm:$0xf]  ;;  %v1100_v15 = vadd.f32 %v1099_v45, %v1077_v18  ;;  %vm1511_vm10 = vcmask 678912  }
 0x343   : > { %v1149_v25 = vcombine.low %v1144_v12, %v1147_v43  ;;  %v1112_v54 = vmul.f32 %v1110_v21, %v1102_v8 }
 0x345   : > { %v2676_v24 = vpop.permute.xlu0 %1256  ;;  %v2678_v26 = vpop.permute.xlu1 %1162  ;;  %v1156_v57 = vrot.slane %v1149_v25, %v2565_v31  ;;  %v1113_v29 = vadd.f32 %v1112_v54, %v1100_v15 }
 0x346   : > { %v1167_v3 = vsel %vm1166_vm11, %v2678_v26, %v2662_v13  ;;  %v1170_v17 = vsel %vm1166_vm11, %v2662_v13, %v2678_v26  ;;  %v1115_v26 = vld [vmem:[#allocation6 + $0x64] sm:$0xf]  ;;  %vm1534_vm11 = vcmask 670720  }
 0x347   : > { %v1172_v13 = vcombine.low %v1167_v3, %v1170_v17  ;;  %v1135_v52 = vmul.f32 %v1133_v39, %v1115_v26  ;;  %v1253_v26 = vld [vmem:[#allocation6 + $0x7c] sm:$0xf] }
 0x349   : > { %v2680_v27 = vpop.permute.xlu0 %1279  ;;  %v2682_v28 = vpop.permute.xlu1 %1185  ;;  %v1179_v63 = vrot.slane %v1172_v13, %v2565_v31  ;;  %v1136_v44 = vadd.f32 %v1135_v52, %v1113_v29 }
 0x34a   : > { %v1190_v23 = vsel %vm1189_vm12, %v2682_v28, %v2664_v16  ;;  %v1193_v55 = vsel %vm1189_vm12, %v2664_v16, %v2682_v28  ;;  %v1138_v16 = vld [vmem:[#allocation6 + $0x68] sm:$0xf]  ;;  %vm1557_vm12 = vcmask 662528  }
 0x34b   : > { %v1195_v10 = vcombine.low %v1190_v23, %v1193_v55  ;;  %v1158_v56 = vmul.f32 %v1156_v57, %v1138_v16  ;;  %v1181_v45 = vmul.f32 %v1179_v63, %v1161_v30  ;;  %v1230_v23 = vld [vmem:[#allocation6 + $0x78] sm:$0xf]  ;;  %v1276_v16 = vld [vmem:[#allocation6 + $0x80] sm:$0xf] }
 0x34d   : > { %v2686_v34 = vpop.permute.xlu0 %1302  ;;  %v2688_v5 = vpop.permute.xlu1 %1208  ;;  %v1202_v7 = vrot.slane %v1195_v10, %v2565_v31  ;;  %v1159_v18 = vadd.f32 %v1158_v56, %v1136_v44 }
 0x34e   : > { %v1213_v51 = vsel %vm1212_vm13, %v2688_v5, %v2668_v20  ;;  %v1216_v53 = vsel %vm1212_vm13, %v2668_v20, %v2688_v5  ;;  %vm1580_vm13 = vcmask 654336  }
 0x34f   : > { %v1218_v20 = vcombine.low %v1213_v51, %v1216_v53 }
 0x351   : > { %v2694_v42 = vpop.permute.xlu0 %1325  ;;  %v2696_v14 = vpop.permute.xlu1 %1231 }
 0x352   : > { %v1236_v28 = vsel %vm1235_vm14, %v2696_v14, %v2672_v22  ;;  %v1239_v61 = vsel %vm1235_vm14, %v2672_v22, %v2696_v14  ;;  %v1184_v14 = vld [vmem:[#allocation6 + $0x70] sm:$0xf]  ;;  %vm1603_vm14 = vcmask 646144  }
 0x353   : > { %v1241_v41 = vcombine.low %v1236_v28, %v1239_v61  ;;  %v1204_v21 = vmul.f32 %v1202_v7, %v1184_v14 }
 0x355   : > { %v2702_v49 = vpop.permute.xlu0 %1348  ;;  %v2704_v50 = vpop.permute.xlu1 %1254  ;;  %v1248_v25 = vrot.slane %v1241_v41, %v2565_v31  ;;  %v1322_v41 = vld [vmem:[#allocation6 + $0x88] sm:$0xf] }
 0x356   : > { %v1259_v6 = vsel %vm1258_vm15, %v2704_v50, %v2676_v24  ;;  %v1262_v1 = vsel %vm1258_vm15, %v2676_v24, %v2704_v50  ;;  %v1225_v24 = vrot.slane %v1218_v20, %v2565_v31  ;;  %v1299_v20 = vld [vmem:[#allocation6 + $0x84] sm:$0xf]  ;;  %vm1626_vm15 = vcmask 637952  }
 0x357   : > { %v1264_v50 = vcombine.low %v1259_v6, %v1262_v1  ;;  %v1250_v57 = vmul.f32 %v1248_v25, %v1230_v23 }
 0x359   : > { %v2710_v40 = vpop.permute.xlu0 %1371  ;;  %v2712_v2 = vpop.permute.xlu1 %1277  ;;  %v1271_v39 = vrot.slane %v1264_v50, %v2565_v31 }
 0x35a   : > { %v1282_v12 = vsel %vm1281_vm1, %v2712_v2, %v2680_v27  ;;  %v1285_v43 = vsel %vm1281_vm1, %v2680_v27, %v2712_v2  ;;  %vm1649_vm1 = vcmask 629760  }
 0x35b   : > { %v1287_v8 = vcombine.low %v1282_v12, %v1285_v43  ;;  %v1273_v52 = vmul.f32 %v1271_v39, %v1253_v26 }
 0x35d   : > { %v2725_v48 = vpop.permute.xlu0 %1394  ;;  %v2727_v60 = vpop.permute.xlu1 %1300 }
 0x35e   : > { %v1305_v3 = vsel %vm1304_vm2, %v2727_v60, %v2686_v34  ;;  %v1308_v17 = vsel %vm1304_vm2, %v2686_v34, %v2727_v60  ;;  %v1182_v34 = vadd.f32 %v1181_v45, %v1159_v18  ;;  %v1227_v60 = vmul.f32 %v1225_v24, %v1207_v46 }
 0x35f   : > { %v1310_v13 = vcombine.low %v1305_v3, %v1308_v17  ;;  %vm1677_vm2 = vcmask 1041408  }
 0x360   : > { %v1205_v54 = vadd.f32 %v1204_v21, %v1182_v34  ;;  %v1368_v21 = vld [vmem:[#allocation6 + $0x90] sm:$0xf] }
 0x361   : > { %v2731_v19 = vpop.permute.xlu0 %1417  ;;  %v2733_v59 = vpop.permute.xlu1 %1323 }
 0x362   : > { %v1328_v55 = vsel %vm1327_vm3, %v2733_v59, %v2694_v42  ;;  %v1331_v15 = vsel %vm1327_vm3, %v2694_v42, %v2733_v59  ;;  %v1294_v42 = vrot.slane %v1287_v8, %v2565_v31  ;;  %v1228_v29 = vadd.f32 %v1227_v60, %v1205_v54 }
 0x363   : > { %v1333_v59 = vcombine.low %v1328_v55, %v1331_v15  ;;  %v1391_v15 = vld [vmem:[#allocation6 + $0x94] sm:$0xf] }
 0x364   : > { %v1251_v1 = vadd.f32 %v1250_v57, %v1228_v29  ;;  %v1296_v56 = vmul.f32 %v1294_v42, %v1276_v16 }
 0x365   : > { %v2742_v9 = vpop.permute.xlu0 %1440  ;;  %v2744_v58 = vpop.permute.xlu1 %1346 }
 0x366   : > { %v1351_v51 = vsel %vm1350_vm4, %v2744_v58, %v2702_v49  ;;  %v1354_v53 = vsel %vm1350_vm4, %v2702_v49, %v2744_v58  ;;  %v1317_v49 = vrot.slane %v1310_v13, %v2565_v31  ;;  %v1274_v43 = vadd.f32 %v1273_v52, %v1251_v1 }
 0x367   : > { %v1356_v58 = vcombine.low %v1351_v51, %v1354_v53  ;;  %v1414_v53 = vld [vmem:[#allocation6 + $0x98] sm:$0xf] }
 0x368   : > { %v1319_v44 = vmul.f32 %v1317_v49, %v1299_v20  ;;  %v1297_v46 = vadd.f32 %v1296_v56, %v1274_v43 }
 0x369   : > { %v2755_v11 = vpop.permute.xlu0 %1463  ;;  %v2757_v47 = vpop.permute.xlu1 %1369  ;;  %v1363_v45 = vrot.slane %v1356_v58, %v2565_v31 }
 0x36a   : > { %v1374_v28 = vsel %vm1373_vm5, %v2757_v47, %v2710_v40  ;;  %v1377_v61 = vsel %vm1373_vm5, %v2710_v40, %v2757_v47  ;;  %v1340_v40 = vrot.slane %v1333_v59, %v2565_v31  ;;  %v1320_v23 = vadd.f32 %v1319_v44, %v1297_v46 }
 0x36b   : > { %v1379_v47 = vcombine.low %v1374_v28, %v1377_v61  ;;  %v1437_v28 = vld [vmem:[#allocation6 + $0x9c] sm:$0xf] }
 0x36c   : > { %v1342_v3 = vmul.f32 %v1340_v40, %v1322_v41  ;;  %v1483_v41 = vld [vmem:[#allocation6 + $0xa4] sm:$0xf] }
 0x36d   : > { %v2769_v62 = vpop.permute.xlu1 %1392  ;;  %v2776_v5 = vpop.permute.xlu0 %1486  ;;  %v1386_v17 = vrot.slane %v1379_v47, %v2565_v31 }
 0x36e   : > { %v1397_v30 = vsel %vm1396_vm6, %v2769_v62, %v2725_v48  ;;  %v1400_v6 = vsel %vm1396_vm6, %v2725_v48, %v2769_v62  ;;  %v1345_v62 = vld [vmem:[#allocation6 + $0x8c] sm:$0xf]  ;;  %v1343_v39 = vadd.f32 %v1342_v3, %v1320_v23 }
 0x36f   : > { %v1402_v48 = vcombine.low %v1397_v30, %v1400_v6  ;;  %v1365_v55 = vmul.f32 %v1363_v45, %v1345_v62  ;;  %v1388_v13 = vmul.f32 %v1386_v17, %v1368_v21  ;;  %v1460_v6 = vld [vmem:[#allocation6 + $0xa0] sm:$0xf] }
 0x371   : > { %v1416_v22 = vpop.permute.xlu1 %1415  ;;  %v2795_v27 = vpop.permute.xlu0 %1509  ;;  %v1366_v42 = vadd.f32 %v1365_v55, %v1343_v39  ;;  %v1575_v39 = vld [vmem:[#allocation6 + $0xb4] sm:$0xf] }
 0x372   : > { %v1420_v14 = vsel %vm1419_vm7, %v1416_v22, %v2731_v19  ;;  %v1423_v12 = vsel %vm1419_vm7, %v2731_v19, %v1416_v22 }
 0x373   : > { %v1425_v18 = vcombine.low %v1420_v14, %v1423_v12  ;;  %v1389_v52 = vadd.f32 %v1388_v13, %v1366_v42 }
 0x375   : > { %v1439_v2 = vpop.permute.xlu1 %1438  ;;  %v1533_v63 = vpop.permute.xlu0 %1532  ;;  %v1432_v26 = vrot.slane %v1425_v18, %v2565_v31  ;;  %v1529_v18 = vld [vmem:[#allocation6 + $0xac] sm:$0xf] }
 0x376   : > { %v1443_v24 = vsel %vm1442_vm8, %v1439_v2, %v2742_v9  ;;  %v1446_v50 = vsel %vm1442_vm8, %v2742_v9, %v1439_v2  ;;  %v1409_v9 = vrot.slane %v1402_v48, %v2565_v31  ;;  %v1506_v48 = vld [vmem:[#allocation6 + $0xa8] sm:$0xf] }
 0x377   : > { %v1448_v2 = vcombine.low %v1443_v24, %v1446_v50  ;;  %v1434_v49 = vmul.f32 %v1432_v26, %v1414_v53  ;;  %v1598_v53 = vld [vmem:[#allocation6 + $0xb8] sm:$0xf] }
 0x378   : > { %v1411_v59 = vmul.f32 %v1409_v9, %v1391_v15 }
 0x379   : > { %v1462_v10 = vpop.permute.xlu1 %1461  ;;  %v1556_v19 = vpop.permute.xlu0 %1555 }
 0x37a   : > { %v1466_v25 = vsel %vm1465_vm9, %v1462_v10, %v2755_v11  ;;  %v1469_v8 = vsel %vm1465_vm9, %v2755_v11, %v1462_v10  ;;  %v1455_v10 = vrot.slane %v1448_v2, %v2565_v31  ;;  %v1412_v56 = vadd.f32 %v1411_v59, %v1389_v52 }
 0x37b   : > { %v1471_v51 = vcombine.low %v1466_v25, %v1469_v8  ;;  %v1552_v8 = vld [vmem:[#allocation6 + $0xb0] sm:$0xf] }
 0x37c   : > { %v1457_v40 = vmul.f32 %v1455_v10, %v1437_v28  ;;  %v1435_v14 = vadd.f32 %v1434_v49, %v1412_v56 }
 0x37d   : > { %v1485_v7 = vpop.permute.xlu1 %1484  ;;  %v1478_v58 = vrot.slane %v1471_v51, %v2565_v31 }
 0x37e   : > { %v1489_v34 = vsel %vm1488_vm0, %v1485_v7, %v2776_v5  ;;  %v1492_v60 = vsel %vm1488_vm0, %v2776_v5, %v1485_v7  ;;  %v1579_v5 = vpop.permute.xlu0 %1578  ;;  %v1458_v50 = vadd.f32 %v1457_v40, %v1435_v14 }
 0x37f   : > { %v1494_v16 = vcombine.low %v1489_v34, %v1492_v60 }
 0x381   : > { %v1508_v22 = vpop.permute.xlu1 %1507  ;;  %v1501_v47 = vrot.slane %v1494_v16, %v2565_v31 }
 0x382   : > { %v1512_v54 = vsel %vm1511_vm10, %v1508_v22, %v2795_v27  ;;  %v1515_v57 = vsel %vm1511_vm10, %v2795_v27, %v1508_v22  ;;  %v1602_v12 = vpop.permute.xlu0 %1601 }
 0x383   : > { %v1517_v20 = vcombine.low %v1512_v54, %v1515_v57  ;;  %v1503_v46 = vmul.f32 %v1501_v47, %v1483_v41 }
 0x385   : > { %v1531_v11 = vpop.permute.xlu1 %1530  ;;  %v1524_v43 = vrot.slane %v1517_v20, %v2565_v31 }
 0x386   : > { %v1535_v61 = vsel %vm1534_vm11, %v1531_v11, %v1533_v63  ;;  %v1538_v29 = vsel %vm1534_vm11, %v1533_v63, %v1531_v11  ;;  %v1480_v63 = vmul.f32 %v1478_v58, %v1460_v6  ;;  %v1625_v2 = vpop.permute.xlu0 %1624 }
 0x387   : > { %v1540_v7 = vcombine.low %v1535_v61, %v1538_v29  ;;  %v1526_v22 = vmul.f32 %v1524_v43, %v1506_v48 }
 0x389   : > { %v1554_v30 = vpop.permute.xlu1 %1553  ;;  %v1547_v3 = vrot.slane %v1540_v7, %v2565_v31 }
 0x38a   : > { %v1558_v27 = vsel %vm1557_vm12, %v1554_v30, %v1556_v19  ;;  %v1561_v1 = vsel %vm1557_vm12, %v1556_v19, %v1554_v30  ;;  %v1481_v19 = vadd.f32 %v1480_v63, %v1458_v50  ;;  %v1648_v16 = vpop.permute.xlu0 %1647 }
 0x38b   : > { %v1563_v44 = vcombine.low %v1558_v27, %v1561_v1  ;;  %v1549_v15 = vmul.f32 %v1547_v3, %v1529_v18  ;;  %v1644_v27 = vld [vmem:[#allocation6 + $0xc0] sm:$0xf] }
 0x38c   : > { %v1504_v9 = vadd.f32 %v1503_v46, %v1481_v19 }
 0x38d   : > { %v1577_v45 = vpop.permute.xlu1 %1576  ;;  %v1570_v21 = vrot.slane %v1563_v44, %v2565_v31 }
 0x38e   : > { %v1581_v62 = vsel %vm1580_vm13, %v1577_v45, %v1579_v5  ;;  %v1584_v24 = vsel %vm1580_vm13, %v1579_v5, %v1577_v45  ;;  %v1527_v13 = vadd.f32 %v1526_v22, %v1504_v9  ;;  %v1621_v5 = vld [vmem:[#allocation6 + $0xbc] sm:$0xf] }
 0x38f   : > { %v1586_v17 = vcombine.low %v1581_v62, %v1584_v24  ;;  %v1572_v26 = vmul.f32 %v1570_v21, %v1552_v8 }
 0x390   : > { %v1550_v42 = vadd.f32 %v1549_v15, %v1527_v13 }
 0x391   : > { %v1600_v25 = vpop.permute.xlu1 %1599  ;;  %v1593_v34 = vrot.slane %v1586_v17, %v2565_v31  ;;  %v1692_v17 = vstv %s326_s13 }
 0x392   : > { %v1604_v23 = vsel %vm1603_vm14, %v1600_v25, %v1602_v12  ;;  %v1607_v55 = vsel %vm1603_vm14, %v1602_v12, %v1600_v25  ;;  %v1573_v28 = vadd.f32 %v1572_v26, %v1550_v42 }
 0x393   : > { %v1609_v60 = vcombine.low %v1604_v23, %v1607_v55  ;;  %v1595_v59 = vmul.f32 %v1593_v34, %v1575_v39 }
 0x395   : > { %v1616_v51 = vrot.slane %v1609_v60, %v2565_v31  ;;  %v1623_v11 = vpop.permute.xlu1 %1622  ;;  %v1596_v20 = vadd.f32 %v1595_v59, %v1573_v28 }
 0x396   : > { %v1627_v54 = vsel %vm1626_vm15, %v1623_v11, %v1625_v2  ;;  %v1630_v57 = vsel %vm1626_vm15, %v1625_v2, %v1623_v11 }
 0x397   : > { %v1632_v10 = vcombine.low %v1627_v54, %v1630_v57  ;;  %v1618_v61 = vmul.f32 %v1616_v51, %v1598_v53 }
 0x399   : > { %v1639_v29 = vrot.slane %v1632_v10, %v2565_v31  ;;  %v1646_v52 = vpop.permute.xlu1 %1645  ;;  %v1619_v1 = vadd.f32 %v1618_v61, %v1596_v20 }
 0x39a   : > { %v1650_v49 = vsel %vm1649_vm1, %v1646_v52, %v1648_v16  ;;  %v1653_v58 = vsel %vm1649_vm1, %v1648_v16, %v1646_v52 }
 0x39b   : > { %v1641_v30 = vmul.f32 %v1639_v29, %v1621_v5  ;;  %v1655_v6 = vcombine.low %v1650_v49, %v1653_v58 }
 0x39d   : > { %v1662_v56 = vrot.slane %v1655_v6, %v2565_v31  ;;  %v1642_v40 = vadd.f32 %v1641_v30, %v1619_v1 }
 0x39f   : > { %v1664_v47 = vmul.f32 %v1662_v56, %v1644_v27 }
 0x3a1   : > { %v1665_v7 = vadd.f32 %v1664_v47, %v1642_v40 }
 0x3a3   : > { %v1673_v41 = vrot.slane %v1665_v7, %v2565_v31 }
 0x3a5   : > { %v1674_v14 = vcombine.high %v1673_v41, %v1673_v41  ;;  %v1678_v63 = vsel %vm1677_vm2, %v1673_v41, 0.0 }
 0x3a6   : > { %v1679_v12 = vrot.slane %v1678_v63, 4 }
 0x3a7   : > { %v1685_v43 = vsel %vm1677_vm2, %v1674_v14, 0.0 }
 0x3a8   : > { %v1680_v44 = vadd.f32 %v1679_v12, %v1678_v63  ;;  %v1686_v45 = vrot.slane %v1685_v43, 4 }
 0x3aa   : > { %v1681_v48 = vrot.slane %v1680_v44, 2  ;;  %v1687_v62 = vadd.f32 %v1686_v45, %v1685_v43 }
 0x3ac   : > { %v1682_v24 = vadd.f32 %v1681_v48, %v1680_v44  ;;  %v1688_v50 = vrot.slane %v1687_v62, 2 }
 0x3ae   : > { %v1683_v46 = vrot.slane %v1682_v24, 1  ;;  %v1689_v3 = vadd.f32 %v1688_v50, %v1687_v62 }
 0x3b0   : > { %v1684_v18 = vadd.f32 %v1683_v46, %v1682_v24  ;;  %v1690_v19 = vrot.slane %v1689_v3, 1 }
 0x3b2   : > { %v1691_v22 = vadd.f32 %v1690_v19, %v1689_v3  ;;  %v1693_v21 = vadd.f32 %v1692_v17, %v1684_v18 }
 0x3b4   : > { %v1694_v31 = vadd.f32 %v1692_v17, %v1691_v22  ;;  %v1695_v25 = vsub.f32 0.0, %v1693_v21 }
 0x3b6   : > { %v1696_v8 = vsub.f32 0.0, %v1694_v31  ;;  %v1697_v23 = vmul.f32 1.442695, %v1695_v25 }
 0x3b8   : > { %1968 = vpow2.f32 %v1697_v23  ;;  %v1699_v55 = vmul.f32 1.442695, %v1696_v8 }
 0x3ba   : > { %1970 = vpow2.f32 %v1699_v55 }
 0x3c2   : > { %v1969_v9 = vpop.eup %1968 }
 0x3c3   : > { %v1701_v2 = vadd.f32 1.0, %v1969_v9 }
 0x3c4   : > { %v1971_v15 = vpop.eup %1970 }
 0x3c5   : > { %v1702_v34 = vadd.f32 1.0, %v1971_v15  ;;  %1972 = vrcp.f32 %v1701_v2 }
 0x3c7   : > { %1974 = vrcp.f32 %v1702_v34 }
 0x3cf   : > { %v1973_v60 = vpop.eup %1972 }
 0x3d0   : > { %v1707_v39 = vmul.f32 %v1973_v60, %v2457_v35  ;;  %v1709_v13 = vmul.f32 %v1973_v60, %v2451_v32  ;;  %v1711_v26 = vmul.f32 %v1973_v60, %v2463_v37  ;;  %v1713_v51 = vmul.f32 %v1973_v60, %v2475_v4 }
 0x3d1   : > { %v1975_v11 = vpop.eup %1974 }
 0x3d2   : > { %v1708_v53 = vmul.f32 %v1975_v11, %v2460_v36  ;;  %v1710_v54 = vmul.f32 %v1975_v11, %v2454_v33  ;;  %v1712_v35 = vmul.f32 %v1975_v11, %v2466_v38  ;;  %v1714_v32 = vmul.f32 %v1975_v11, %v2478_v0  ;;  %1715 = vst [vmem:[%s312_s8] sm:$0xff] %v1707_v39 }
 0x3d3   : > { %1717 = vst [vmem:[%s312_s8 + $0x10] sm:$0xff] %v1709_v13  ;;  %1719 = vst [vmem:[%s312_s8 + $0x20] sm:$0xff] %v1711_v26 }
 0x3d4   : > { %1721 = vst [vmem:[%s312_s8 + $0x30] sm:$0xff] %v1713_v51  ;;  %1716 = vst [vmem:[%s312_s8 + $0x8] sm:$0xff] %v1708_v53 }
 0x3d5   : > { %1718 = vst [vmem:[%s312_s8 + $0x18] sm:$0xff] %v1710_v54  ;;  %1720 = vst [vmem:[%s312_s8 + $0x28] sm:$0xff] %v1712_v35 }
 0x3d6   : > { %1722 = vst [vmem:[%s312_s8 + $0x38] sm:$0xff] %v1714_v32 }
 0x3d7   : > { %2047 = shalt.err (!%p2044_p7)
}
 0x3d8   : > { %s2048_s30 = scalar_lea.hbm %s2874_s25, 1024  ;;  %s2052_s20 = scalar_lea.hbm %s2932_s7, 2048 }
 0x3d9   : > { %p2049_p9 = scmp.ne.s32.totalorder %s2874_s25, %s2048_s30  ;;  %p2053_p5 = scmp.lt.u32.totalorder %s2874_s25, %s2932_s7 }
 0x3da   : > { %p2054_p11 = scmp.lt.u32.totalorder %s2052_s20, %s2048_s30  ;;  %p2056_p4 = scmp.lt.u32.totalorder %s2048_s30, %s2874_s25 }
 0x3db   : > { %p2050_p2 = pnand %p2049_p9, %p2298_p12 }
 0x3dc   : > { %p2055_p1 = por %p2054_p11, %p2053_p5 }
 0x3dd   : > { %p2051_p0 = pneg %p2050_p2 }
 0x3de   : > { %p2057_p6 = por %p2056_p4, %p2055_p1 }
 0x3e0   : > { %p2058_p8 = pnand %p2057_p6, %p2051_p0 }
 0x3e2   : > { %2061 = shalt.err (!%p2058_p8)
}
 0x3e3   : > { %s2163_s15 = smov 256  }
 0x3e4   : > { %1844 = dma.vmem_to_hbm [thread:$0]  (%p2298_p12), %s2880_s10, 1024, %s2874_s25, %s1724_s6, %s2163_s15, %s2163_s15, %s2130_s16  }
 0x3e5 PF: > { %s1752_s22 = sand.u32 1, %s2092_s26   ;;  %p2947_p10 = scmp.ne.s32.totalorder %s2937_s9, 0 }
 0x3e6   : > { %p2948_p13 = scmp.ge.s32.totalorder %s2104_s29, 2  ;;  %s1753_s23 = scalar_lea.sflag [#allocation5], %s1752_s22 }
 0x3e8   : > { %p1855_p3 = pnand %p2948_p13, %p2947_p10 }
 0x3ea   : > { %2087 = dma.done.wait (!%p1855_p3), %s1753_s23, 1024  }
 0x3eb   : > { %2089 = vsyncadd (!%p1855_p3), %s1753_s23, 4294966272  ;;  %p22_p7 = scmp.ge.s32.totalorder %s2263_s14, 4   ;;  %s2949_s26 = smov %s2096_s27 }
 0x3ec   : > { %s2950_s27 = smov %s2100_s28  ;;  %s2951_s28 = smov %s2294_s18 }
 0x3ed   : > { %s2952_s29 = smov %s2263_s14  ;;  %24 = sbr.rel (!%p22_p7) target bundleno = 8 (0x8), region = 145 }
 0x3f4   :  { %1758 = vsyncpa [#allocation4], 1 }
 0x3f5   :  { %1760 = vsyncpa [#allocation4 + $0x1], 1 }
 0x3f6   :  { %1761 = vsyncpa [#allocation7], 1 }
 0x3f7   :  { %1762 = vsyncpa [#allocation5], 1 }
 0x3f8   :  { %1764 = vsyncpa [#allocation5 + $0x1], 1 }

</bundles_post_ra>
